<compile_context>
chip_gen: v7x
topology: tpu7x:2x2x1
jax: 0.10.0
libtpu: 0.0.40
codegen_flags: <defaults>
</compile_context>

<pallas_src>
import functools

import jax
import jax.numpy as jnp
from jax.experimental import pallas as pl
from jax.experimental.pallas import tpu as pltpu

ACT_DTYPE = jnp.bfloat16            # inter-layer activations / MXU operands
VMEM_BUDGET = 26 * 1024 * 1024      # target bytes for blocks + kernel temps
VMEM_LIMIT = 48 * 1024 * 1024       # scoped VMEM limit (fits v7x's 64 MiB/TC)


def _round_up(x, m):
    return (x + m - 1) // m * m


def _pair(v):
    return tuple(v) if isinstance(v, (tuple, list)) else (v, v)


def _divisors_desc(n):
    return [d for d in range(n, 0, -1) if n % d == 0]


# ----------------------------------------------------------------------------
# Kernel 1: fused (full-im2col matmul + bias + optional residual + activation)
# The reduction is a single block: no accumulator scratch, no k-phase control.
# ----------------------------------------------------------------------------
def _mm_kernel(x_ref, w_ref, b_ref, o_ref, *, act):
    y = jnp.dot(x_ref[...], w_ref[...], preferred_element_type=jnp.float32)
    y = y + b_ref[...]
    if act == "relu":
        y = jnp.maximum(y, 0.0)
    elif act == "sigmoid":
        y = jax.nn.sigmoid(y)
    o_ref[...] = y.astype(o_ref.dtype)


def _mm_kernel_res(x_ref, w_ref, b_ref, r_ref, o_ref, *, act):
    y = jnp.dot(x_ref[...], w_ref[...], preferred_element_type=jnp.float32)
    y = y + b_ref[...] + r_ref[...].astype(jnp.float32)
    if act == "relu":
        y = jnp.maximum(y, 0.0)
    elif act == "sigmoid":
        y = jax.nn.sigmoid(y)
    o_ref[...] = y.astype(o_ref.dtype)


def _choose_tiles(M, K, Co):
    """Largest MXU-friendly (TM, TN) keeping double-buffered blocks in budget."""
    Np = _round_up(Co, 128)
    TN = min(Np, 512)
    while Np % TN:
        TN //= 2

    def need(tm, tn):
        # 2x (double buffer) * [x(bf16) + w(bf16) + residual(bf16) + out(bf16)]
        # + f32 epilogue temp
        return (2 * (tm * K * 2 + K * tn * 2 + tm * tn * 2 + tm * tn * 2)
                + tm * tn * 4 + 8 * tn)

    TM = 4096
    while TM > 128 and need(TM, TN) > VMEM_BUDGET:
        TM //= 2
    if need(TM, TN) > VMEM_BUDGET:
        TN = 128                      # Np is always a multiple of 128
    if M <= TM:                       # single (8-aligned) M tile
        TM = max(8, _round_up(M, 8))
    Mp = _round_up(M, TM)
    return Mp, TM, Np, TN


def _conv_mm(xcol, w2d, bias, residual, act, out_dtype):
    """out[m, co] = act(xcol[m, :] @ w2d[:, co] + bias[co] (+ residual[m, co]))."""
    M, K = xcol.shape
    Co = w2d.shape[1]
    Mp, TM, Np, TN = _choose_tiles(M, K, Co)

    xp = xcol if Mp == M else jnp.pad(xcol, ((0, Mp - M), (0, 0)))
    wp = w2d if Np == Co else jnp.pad(w2d, ((0, 0), (0, Np - Co)))
    bp = (bias if Np == Co else jnp.pad(bias, (0, Np - Co))).reshape(1, Np)

    ins = [xp, wp, bp]
    in_specs = [
        pl.BlockSpec((TM, K), lambda n, m: (m, 0)),   # im2col rows (streamed)
        pl.BlockSpec((K, TN), lambda n, m: (0, n)),   # weights (resident per n)
        pl.BlockSpec((1, TN), lambda n, m: (0, n)),   # folded BN bias
    ]
    if residual is not None:
        rp = residual
        if Mp != M or Np != Co:
            rp = jnp.pad(residual, ((0, Mp - M), (0, Np - Co)))
        ins.append(rp)
        in_specs.append(pl.BlockSpec((TM, TN), lambda n, m: (m, n)))
        kernel = functools.partial(_mm_kernel_res, act=act)
    else:
        kernel = functools.partial(_mm_kernel, act=act)

    out = pl.pallas_call(
        kernel,
        out_shape=jax.ShapeDtypeStruct((Mp, Np), out_dtype),
        grid=(Np // TN, Mp // TM),          # M innermost -> weight block resident
        in_specs=in_specs,
        out_specs=pl.BlockSpec((TM, TN), lambda n, m: (m, n)),
        compiler_params=pltpu.CompilerParams(
            dimension_semantics=("parallel", "parallel"),
            vmem_limit_bytes=VMEM_LIMIT),
    )(*ins)
    if Mp != M or Np != Co:
        out = out[:M, :Co]
    return out


# ----------------------------------------------------------------------------
# Kernel 2: "row-tap" fused conv for stride-1 kxk convolutions.
# Inputs are the kh row-shifted copies of the (spatially padded) image; the
# kw column taps are gathered in-kernel (VMEM slices + lane concat) and the
# reduction is kh partial MXU dots of K = kw*C accumulated in f32.
# ----------------------------------------------------------------------------
def _rowtap_kernel(*refs, k, ow, cin, act, has_res):
    xs = refs[:k]
    w_ref, b_ref = refs[k], refs[k + 1]
    res_ref = refs[k + 2] if has_res else None
    o_ref = refs[-1]

    tr = xs[0].shape[0]
    kc = k * cin
    y = None
    for i in range(k):
        if k > 1:
            cols = [xs[i][:, j:j + ow, :] for j in range(k)]
            xi = jnp.concatenate(cols, axis=-1)        # (TR, OW, kw*C)
        else:
            xi = xs[i][:, :ow, :]
        xmat = xi.reshape(tr * ow, kc)
        wi = w_ref[i * kc:(i + 1) * kc, :]             # (kw*C, TN)
        part = jnp.dot(xmat, wi, preferred_element_type=jnp.float32)
        y = part if y is None else y + part

    y = y + b_ref[...]
    if has_res:
        r = res_ref[...].astype(jnp.float32)
        pad_n = o_ref.shape[-1] - r.shape[-1]
        if pad_n:                                      # lane-pad to the TN tile
            r = jnp.concatenate(
                [r, jnp.zeros((r.shape[0], pad_n), jnp.float32)], axis=-1)
        y = y + r
    if act == "relu":
        y = jnp.maximum(y, 0.0)
    elif act == "sigmoid":
        y = jax.nn.sigmoid(y)
    o_ref[...] = y.astype(o_ref.dtype)


def _choose_rowtap_tiles(R, OW, Wp, C, K, Co, has_res, k):
    Np = _round_up(Co, 128)
    TN = min(Np, 256)
    while Np % TN:
        TN //= 2

    def need(tr, tn):
        fixed = 2 * K * tn * 2 + 8 * tn               # weights (dbl buf) + bias
        per_m = (k * Wp * C * 2 * 2                   # row-tap blocks (dbl buf)
                 + OW * tn * 2 * 2                    # output block (dbl buf)
                 + (OW * tn * 2 * 2 if has_res else 0)
                 + OW * (k * C * 4 + tn * 12))        # in-kernel temporaries
        return fixed + tr * per_m

    cand_tn = [TN, 128] if TN > 128 else [TN]
    for tn in cand_tn:
        for tr in _divisors_desc(R):
            if need(tr, tn) <= VMEM_BUDGET:
                return tr, Np, tn
    return 1, Np, 128


def _conv_rowtap(x, p, k, pad, residual, act, out_dtype):
    """Stride-1 kxk conv -> BN -> (+x) -> act via the row-tap Pallas kernel."""
    N, H, W, C = x.shape
    OH = H + 2 * pad - k + 1
    OW = W + 2 * pad - k + 1
    Wp = W + 2 * pad
    Co = p["w"].shape[1]
    K = k * k * C
    if residual:
        assert OH == H and OW == W and Co == C

    xp = jnp.pad(x, ((0, 0), (pad, pad), (pad, pad), (0, 0))) if pad else x
    R = N * OH
    M = R * OW
    taps = [xp[:, i:i + OH, :, :].reshape(R, Wp, C) for i in range(k)]

    TR, Np, TN = _choose_rowtap_tiles(R, OW, Wp, C, K, Co, residual, k)
    wp_ = p["w"] if Np == Co else jnp.pad(p["w"], ((0, 0), (0, Np - Co)))
    bp = (p["b"] if Np == Co else jnp.pad(p["b"], (0, Np - Co))).reshape(1, Np)

    tap_spec = pl.BlockSpec((TR, Wp, C), lambda n, r: (r, 0, 0))
    ins = list(taps) + [wp_, bp]
    in_specs = [tap_spec] * k + [
        pl.BlockSpec((K, TN), lambda n, r: (0, n)),
        pl.BlockSpec((1, TN), lambda n, r: (0, n)),
    ]
    if residual:
        ins.append(x.reshape(M, C))
        if Co % 128 == 0:           # residual tiles along Cout like the output
            in_specs.append(pl.BlockSpec((TR * OW, TN), lambda n, r: (r, n)))
        else:                       # single Cout tile; pad lanes in-kernel
            in_specs.append(pl.BlockSpec((TR * OW, C), lambda n, r: (r, 0)))

    kernel = functools.partial(_rowtap_kernel, k=k, ow=OW, cin=C, act=act,
                               has_res=residual)
    out = pl.pallas_call(
        kernel,
        out_shape=jax.ShapeDtypeStruct((M, Np), out_dtype),
        grid=(Np // TN, R // TR),           # M innermost -> weight block resident
        in_specs=in_specs,
        out_specs=pl.BlockSpec((TR * OW, TN), lambda n, r: (r, n)),
        compiler_params=pltpu.CompilerParams(
            dimension_semantics=("parallel", "parallel"),
            vmem_limit_bytes=VMEM_LIMIT),
    )(*ins)
    if Np != Co:
        out = out[:, :Co]
    return out.reshape(N, OH, OW, Co)


# ----------------------------------------------------------------------------
# Conv / ConvTranspose wrappers (glue: padding, im2col slices, reshapes)
# ----------------------------------------------------------------------------
def _im2col(x, kh, kw, sh, sw, ph, pw):
    N, H, W, C = x.shape
    OH = (H + 2 * ph - kh) // sh + 1
    OW = (W + 2 * pw - kw) // sw + 1
    if kh == 1 and kw == 1 and sh == 1 and sw == 1:
        return x.reshape(N * OH * OW, C), OH, OW
    xp = jnp.pad(x, ((0, 0), (ph, ph), (pw, pw), (0, 0))) if (ph or pw) else x
    cols = []
    for i in range(kh):
        for j in range(kw):
            cols.append(xp[:, i:i + sh * (OH - 1) + 1:sh,
                           j:j + sw * (OW - 1) + 1:sw, :])
    xcol = jnp.concatenate(cols, axis=-1)          # (N, OH, OW, kh*kw*C)
    return xcol.reshape(N * OH * OW, kh * kw * C), OH, OW


def conv_bn_act(x, p, k, stride, pad, residual=False, act="relu",
                out_dtype=ACT_DTYPE):
    """Conv2d -> folded BN affine -> (+x) -> act, as one Pallas kernel."""
    sh, sw = _pair(stride)
    ph, pw = _pair(pad)
    N, H, W, C = x.shape
    # Row-tap path: stride-1 kxk convs with a lane-friendly layout.  This
    # covers all the heavy decoder / residual / output layers.
    if (k > 1 and sh == 1 and sw == 1 and ph == pw and C >= 32
            and (W + 2 * pw - k + 1) % 8 == 0 and (H + 2 * ph - k + 1) >= 1):
        return _conv_rowtap(x, p, k, ph, residual, act, out_dtype)
    # Fallback: explicit im2col + fused matmul (strided / tiny / odd layers).
    xcol, OH, OW = _im2col(x, k, k, sh, sw, ph, pw)
    res = None
    if residual:
        assert OH == H and OW == W and p["w"].shape[1] == C
        res = x.reshape(N * OH * OW, C)
    out = _conv_mm(xcol, p["w"], p["b"], res, act, out_dtype)
    return out.reshape(N, OH, OW, -1)


def conv_transpose_bn_relu(x, p, k, stride, pad, out_pad):
    """ConvTranspose2d -> folded BN -> ReLU via input dilation + stride-1 conv."""
    sh, sw = _pair(stride)
    ph, pw = _pair(pad)
    oph, opw = _pair(out_pad)
    pt, pb = k - 1 - ph, k - 1 - ph + oph
    plf, prt = k - 1 - pw, k - 1 - pw + opw
    zero = jnp.zeros((), x.dtype)
    xpad = jax.lax.pad(
        x, zero,
        ((0, 0, 0), (pt, pb, sh - 1), (plf, prt, sw - 1), (0, 0, 0)))
    return conv_bn_act(xpad, p, k, 1, 0, residual=False, act="relu")


# ----------------------------------------------------------------------------
# Architecture config (op, cin, cout, k, stride, pad, residual / output_pad)
# ----------------------------------------------------------------------------
FACE_ENCODER_CFG = [
    [("c", 6, 16, 7, 1, 3, False)],
    [("c", 16, 32, 5, 2, 2, False), ("c", 32, 32, 3, 1, 1, True)],
    [("c", 32, 32, 3, 2, 1, False), ("c", 32, 32, 3, 1, 1, True),
     ("c", 32, 32, 3, 1, 1, True)],
    [("c", 32, 64, 3, 2, 1, False), ("c", 64, 64, 3, 1, 1, True),
     ("c", 64, 64, 3, 1, 1, True), ("c", 64, 64, 3, 1, 1, True)],
    [("c", 64, 128, 3, 2, 1, False), ("c", 128, 128, 3, 1, 1, True),
     ("c", 128, 128, 3, 1, 1, True)],
    [("c", 128, 256, 3, 2, 1, False), ("c", 256, 256, 3, 1, 1, True),
     ("c", 256, 256, 3, 1, 1, True)],
    [("c", 256, 512, 3, 2, 1, False), ("c", 512, 512, 3, 1, 1, True)],
    [("c", 512, 512, 3, 1, 0, False), ("c", 512, 512, 1, 1, 0, False)],
    [("c", 512, 512, 3, 1, 0, False), ("c", 512, 512, 1, 1, 0, False)],
]

AUDIO_ENCODER_CFG = [
    ("c", 1, 32, 3, 1, 1, False), ("c", 32, 32, 3, 1, 1, True),
    ("c", 32, 32, 3, 1, 1, True),
    ("c", 32, 64, 3, (3, 1), 1, False), ("c", 64, 64, 3, 1, 1, True),
    ("c", 64, 64, 3, 1, 1, True),
    ("c", 64, 128, 3, 3, 1, False), ("c", 128, 128, 3, 1, 1, True),
    ("c", 128, 128, 3, 1, 1, True),
    ("c", 128, 256, 3, (3, 2), 1, False), ("c", 256, 256, 3, 1, 1, True),
    ("c", 256, 512, 3, 1, 0, False), ("c", 512, 512, 1, 1, 0, False),
]

FACE_DECODER_CFG = [
    [("c", 512, 512, 1, 1, 0, False)],
    [("t", 1024, 512, 3, 1, 0, 0), ("c", 512, 512, 3, 1, 1, True)],
    [("t", 1024, 512, 3, 2, 1, 0), ("c", 512, 512, 3, 1, 1, True),
     ("c", 512, 512, 3, 1, 1, True)],
    [("t", 1024, 512, 3, 2, 1, 0), ("c", 512, 512, 3, 1, 1, True),
     ("c", 512, 512, 3, 1, 1, True)],
    [("t", 768, 384, 3, 2, 1, 1), ("c", 384, 384, 3, 1, 1, True),
     ("c", 384, 384, 3, 1, 1, True)],
    [("t", 512, 256, 3, 2, 1, 1), ("c", 256, 256, 3, 1, 1, True),
     ("c", 256, 256, 3, 1, 1, True)],
    [("t", 320, 128, 3, 2, 1, 1), ("c", 128, 128, 3, 1, 1, True),
     ("c", 128, 128, 3, 1, 1, True)],
    [("t", 160, 64, 3, 2, 1, 1), ("c", 64, 64, 3, 1, 1, True),
     ("c", 64, 64, 3, 1, 1, True)],
    [("t", 96, 64, 3, 2, 1, 1), ("c", 64, 64, 3, 1, 1, True),
     ("c", 64, 64, 3, 1, 1, True)],
]


# ----------------------------------------------------------------------------
# Deterministic synthetic parameters: BN(eval) folded into the weights
# (per-channel scale) and a per-channel f32 bias.  Weights stored as 2-D bf16.
# ----------------------------------------------------------------------------
def _fold(w_hwio, scale, bias, k, cin, cout):
    w2d = (w_hwio.reshape(k * k * cin, cout) * scale[None, :]).astype(ACT_DTYPE)
    return {"w": w2d, "b": bias.astype(jnp.float32)}


def _init_conv(key, cin, cout, k):
    k1, k2, k3 = jax.random.split(key, 3)
    w = jax.random.normal(k1, (k, k, cin, cout), jnp.float32) / jnp.sqrt(
        float(k * k * cin))
    scale = 1.0 + 0.1 * jax.random.normal(k2, (cout,), jnp.float32)
    bias = 0.01 * jax.random.normal(k3, (cout,), jnp.float32)
    return _fold(w, scale, bias, k, cin, cout)


def _init_convT(key, cin, cout, k):
    k1, k2, k3 = jax.random.split(key, 3)
    # PyTorch ConvTranspose2d weight layout (cin, cout, kh, kw) -> equivalent
    # forward-conv HWIO weight (flip spatial, move channels last).
    wt = jax.random.normal(k1, (cin, cout, k, k), jnp.float32) / jnp.sqrt(
        float(k * k * cin))
    w = jnp.transpose(jnp.flip(wt, (2, 3)), (2, 3, 0, 1))
    scale = 1.0 + 0.1 * jax.random.normal(k2, (cout,), jnp.float32)
    bias = 0.01 * jax.random.normal(k3, (cout,), jnp.float32)
    return _fold(w, scale, bias, k, cin, cout)


def _init_plain_conv(key, cin, cout, k):
    k1, k2 = jax.random.split(key)
    w = jax.random.normal(k1, (k, k, cin, cout), jnp.float32) / jnp.sqrt(
        float(k * k * cin))
    bias = 0.01 * jax.random.normal(k2, (cout,), jnp.float32)
    return _fold(w, jnp.ones((cout,), jnp.float32), bias, k, cin, cout)


def init_params(key):
    cnt = [0]

    def nk():
        cnt[0] += 1
        return jax.random.fold_in(key, cnt[0])

    face_enc = [[_init_conv(nk(), c[1], c[2], c[3]) for c in block]
                for block in FACE_ENCODER_CFG]
    audio_enc = [_init_conv(nk(), c[1], c[2], c[3]) for c in AUDIO_ENCODER_CFG]
    face_dec = []
    for block in FACE_DECODER_CFG:
        bl = []
        for c in block:
            if c[0] == "c":
                bl.append(_init_conv(nk(), c[1], c[2], c[3]))
            else:
                bl.append(_init_convT(nk(), c[1], c[2], c[3]))
        face_dec.append(bl)
    out_block = [_init_conv(nk(), 80, 32, 3),       # Conv+BN+ReLU
                 _init_plain_conv(nk(), 32, 3, 1)]  # plain Conv (then Sigmoid)
    return {"face_encoder": face_enc, "audio_encoder": audio_enc,
            "face_decoder": face_dec, "output": out_block}


def _apply_layer(x, p, cfg):
    if cfg[0] == "c":
        _, _, _, k, stride, pad, residual = cfg
        return conv_bn_act(x, p, k, stride, pad, residual, act="relu")
    _, _, _, k, stride, pad, opad = cfg
    return conv_transpose_bn_relu(x, p, k, stride, pad, opad)


# ----------------------------------------------------------------------------
# Full Wav2Lip_288 forward
# ----------------------------------------------------------------------------
def wav2lip_forward(params, audio_sequences, face_sequences):
    # audio: (B,1,80,16) or (B,T,1,80,16); face: (B,6,H,W) or (B,6,T,H,W) (NCHW)
    B = audio_sequences.shape[0]
    input_dim_size = face_sequences.ndim
    if input_dim_size > 4:
        audio_sequences = jnp.concatenate(
            [audio_sequences[:, i] for i in range(audio_sequences.shape[1])],
            axis=0)
        face_sequences = jnp.concatenate(
            [face_sequences[:, :, i] for i in range(face_sequences.shape[2])],
            axis=0)

    a = jnp.transpose(audio_sequences, (0, 2, 3, 1)).astype(ACT_DTYPE)  # NHWC
    x = jnp.transpose(face_sequences, (0, 2, 3, 1)).astype(ACT_DTYPE)

    for p, cfg in zip(params["audio_encoder"], AUDIO_ENCODER_CFG):
        a = _apply_layer(a, p, cfg)
    audio_embedding = a                                   # (N, 1, 1, 512)

    feats = []
    for bp, bcfg in zip(params["face_encoder"], FACE_ENCODER_CFG):
        for p, cfg in zip(bp, bcfg):
            x = _apply_layer(x, p, cfg)
        feats.append(x)

    x = audio_embedding
    for bp, bcfg in zip(params["face_decoder"], FACE_DECODER_CFG):
        for p, cfg in zip(bp, bcfg):
            x = _apply_layer(x, p, cfg)
        x = jnp.concatenate([x, feats[-1]], axis=-1)      # channel concat (NHWC)
        feats.pop()

    # output block: Conv(80->32)+BN+ReLU, plain Conv(32->3,1x1)+bias, Sigmoid
    x = conv_bn_act(x, params["output"][0], 3, 1, 1, act="relu")
    x = conv_bn_act(x, params["output"][1], 1, 1, 0, act="sigmoid",
                    out_dtype=jnp.float32)

    out = jnp.transpose(x, (0, 3, 1, 2))                  # back to NCHW
    if input_dim_size > 4:
        T = out.shape[0] // B
        out = jnp.stack([out[i * B:(i + 1) * B] for i in range(T)], axis=2)
    return out


if __name__ == "__main__":
    root = jax.random.PRNGKey(0)
    kp, ka, kf = jax.random.split(root, 3)
    params = init_params(kp)

    # --- tiny consistency check: row-tap kernel vs explicit-im2col kernel ---
    kx = jax.random.fold_in(root, 99)
    xt = jax.random.normal(kx, (1, 16, 16, 32), jnp.float32).astype(ACT_DTYPE)
    pt = _init_conv(jax.random.fold_in(root, 100), 32, 32, 3)
    y_rt = _conv_rowtap(xt, pt, 3, 1, True, "relu", ACT_DTYPE)
    xcol_t, oh_t, ow_t = _im2col(xt, 3, 3, 1, 1, 1, 1)
    y_ref = _conv_mm(xcol_t, pt["w"], pt["b"], xt.reshape(-1, 32), "relu",
                     ACT_DTYPE).reshape(1, oh_t, ow_t, -1)
    assert jnp.allclose(y_rt.astype(jnp.float32), y_ref.astype(jnp.float32),
                        atol=3e-2, rtol=3e-2), "row-tap / im2col mismatch"

    # Smallest shapes the architecture's skip connections admit: the encoder /
    # decoder spatial ladder (288,144,...,3,1) pins the face input to 288x288
    # and the mel spectrogram to 80x16.  Batch kept at 1.
    audio = jax.random.normal(ka, (1, 1, 80, 16), jnp.float32)
    face = jax.random.uniform(kf, (1, 6, 288, 288), jnp.float32)

    fwd = jax.jit(wav2lip_forward)
    out = jax.block_until_ready(fwd(params, audio, face))

    assert out.shape == (1, 3, 288, 288), out.shape
    assert bool(jnp.isfinite(out).all())
    assert bool((out >= 0.0).all()) and bool((out <= 1.0).all())  # sigmoid range
    print("KERNEL_OK")
</pallas_src>

<mosaic_0001>
module attributes {stable_mosaic.version = 11 : i64} {
  func.func @_rowtap_kernel(%arg0: i32, %arg1: i32, %arg2: memref<16x18x32xbf16, #tpu.memory_space<vmem>>, %arg3: memref<16x18x32xbf16, #tpu.memory_space<vmem>>, %arg4: memref<16x18x32xbf16, #tpu.memory_space<vmem>>, %arg5: memref<288x128xbf16, #tpu.memory_space<vmem>>, %arg6: memref<1x128xf32, #tpu.memory_space<vmem>>, %arg7: memref<256x32xbf16, #tpu.memory_space<vmem>>, %arg8: memref<256x128xbf16, #tpu.memory_space<vmem>>) attributes {dimension_semantics = [#tpu.dimension_semantics<parallel>, #tpu.dimension_semantics<parallel>], iteration_bounds = array<i64: 1, 1>, scalar_prefetch = 0 : i64, scratch_operands = 0 : i64, tpu.core_type = #tpu.core_type<tc>, window_params = [{transform_indices = @transform_0, window_bounds = array<i64: 16, 18, 32>}, {transform_indices = @transform_1, window_bounds = array<i64: 16, 18, 32>}, {transform_indices = @transform_2, window_bounds = array<i64: 16, 18, 32>}, {transform_indices = @transform_3, window_bounds = array<i64: 288, 128>}, {transform_indices = @transform_4, window_bounds = array<i64: 1, 128>}, {transform_indices = @transform_5, window_bounds = array<i64: 256, 32>}, {transform_indices = @transform_6, window_bounds = array<i64: 256, 128>}]} {
    %c0 = arith.constant 0 : index
    %c0_0 = arith.constant 0 : index
    %c0_1 = arith.constant 0 : index
    %0 = vector.load %arg2[%c0, %c0_0, %c0_1] : memref<16x18x32xbf16, #tpu.memory_space<vmem>>, vector<16x16x32xbf16>
    %c0_2 = arith.constant 0 : index
    %c1 = arith.constant 1 : index
    %c0_3 = arith.constant 0 : index
    %1 = vector.load %arg2[%c0_2, %c1, %c0_3] : memref<16x18x32xbf16, #tpu.memory_space<vmem>>, vector<16x16x32xbf16>
    %c0_4 = arith.constant 0 : index
    %c2 = arith.constant 2 : index
    %c0_5 = arith.constant 0 : index
    %2 = vector.load %arg2[%c0_4, %c2, %c0_5] : memref<16x18x32xbf16, #tpu.memory_space<vmem>>, vector<16x16x32xbf16>
    %3 = tpu.concatenate %0, %1, %2 in 2 : vector<16x16x32xbf16>, vector<16x16x32xbf16>, vector<16x16x32xbf16> -> vector<16x16x96xbf16>
    %4 = vector.shape_cast %3 : vector<16x16x96xbf16> to vector<256x96xbf16>
    %c0_6 = arith.constant 0 : index
    %c0_7 = arith.constant 0 : index
    %5 = vector.load %arg5[%c0_6, %c0_7] : memref<288x128xbf16, #tpu.memory_space<vmem>>, vector<96x128xbf16>
    %cst = arith.constant dense<0.000000e+00> : vector<256x128xf32>
    %6 = tpu.matmul %4, %5, %cst {dimension_numbers = #tpu.dot_dimension_numbers<[1], [0], [0], [1], [0, 0, 1, 1], [], []>} : vector<256x96xbf16>, vector<96x128xbf16>, vector<256x128xf32> -> vector<256x128xf32>
    %c0_8 = arith.constant 0 : index
    %c0_9 = arith.constant 0 : index
    %c0_10 = arith.constant 0 : index
    %7 = vector.load %arg3[%c0_8, %c0_9, %c0_10] : memref<16x18x32xbf16, #tpu.memory_space<vmem>>, vector<16x16x32xbf16>
    %c0_11 = arith.constant 0 : index
    %c1_12 = arith.constant 1 : index
    %c0_13 = arith.constant 0 : index
    %8 = vector.load %arg3[%c0_11, %c1_12, %c0_13] : memref<16x18x32xbf16, #tpu.memory_space<vmem>>, vector<16x16x32xbf16>
    %c0_14 = arith.constant 0 : index
    %c2_15 = arith.constant 2 : index
    %c0_16 = arith.constant 0 : index
    %9 = vector.load %arg3[%c0_14, %c2_15, %c0_16] : memref<16x18x32xbf16, #tpu.memory_space<vmem>>, vector<16x16x32xbf16>
    %10 = tpu.concatenate %7, %8, %9 in 2 : vector<16x16x32xbf16>, vector<16x16x32xbf16>, vector<16x16x32xbf16> -> vector<16x16x96xbf16>
    %11 = vector.shape_cast %10 : vector<16x16x96xbf16> to vector<256x96xbf16>
    %c96 = arith.constant 96 : index
    %c0_17 = arith.constant 0 : index
    %12 = vector.load %arg5[%c96, %c0_17] : memref<288x128xbf16, #tpu.memory_space<vmem>>, vector<96x128xbf16>
    %cst_18 = arith.constant dense<0.000000e+00> : vector<256x128xf32>
    %13 = tpu.matmul %11, %12, %cst_18 {dimension_numbers = #tpu.dot_dimension_numbers<[1], [0], [0], [1], [0, 0, 1, 1], [], []>} : vector<256x96xbf16>, vector<96x128xbf16>, vector<256x128xf32> -> vector<256x128xf32>
    %14 = arith.addf %6, %13 : vector<256x128xf32>
    %c0_19 = arith.constant 0 : index
    %c0_20 = arith.constant 0 : index
    %c0_21 = arith.constant 0 : index
    %15 = vector.load %arg4[%c0_19, %c0_20, %c0_21] : memref<16x18x32xbf16, #tpu.memory_space<vmem>>, vector<16x16x32xbf16>
    %c0_22 = arith.constant 0 : index
    %c1_23 = arith.constant 1 : index
    %c0_24 = arith.constant 0 : index
    %16 = vector.load %arg4[%c0_22, %c1_23, %c0_24] : memref<16x18x32xbf16, #tpu.memory_space<vmem>>, vector<16x16x32xbf16>
    %c0_25 = arith.constant 0 : index
    %c2_26 = arith.constant 2 : index
    %c0_27 = arith.constant 0 : index
    %17 = vector.load %arg4[%c0_25, %c2_26, %c0_27] : memref<16x18x32xbf16, #tpu.memory_space<vmem>>, vector<16x16x32xbf16>
    %18 = tpu.concatenate %15, %16, %17 in 2 : vector<16x16x32xbf16>, vector<16x16x32xbf16>, vector<16x16x32xbf16> -> vector<16x16x96xbf16>
    %19 = vector.shape_cast %18 : vector<16x16x96xbf16> to vector<256x96xbf16>
    %c192 = arith.constant 192 : index
    %c0_28 = arith.constant 0 : index
    %20 = vector.load %arg5[%c192, %c0_28] : memref<288x128xbf16, #tpu.memory_space<vmem>>, vector<96x128xbf16>
    %cst_29 = arith.constant dense<0.000000e+00> : vector<256x128xf32>
    %21 = tpu.matmul %19, %20, %cst_29 {dimension_numbers = #tpu.dot_dimension_numbers<[1], [0], [0], [1], [0, 0, 1, 1], [], []>} : vector<256x96xbf16>, vector<96x128xbf16>, vector<256x128xf32> -> vector<256x128xf32>
    %22 = arith.addf %14, %21 : vector<256x128xf32>
    %c0_30 = arith.constant 0 : index
    %c0_31 = arith.constant 0 : index
    %23 = vector.load %arg6[%c0_30, %c0_31] : memref<1x128xf32, #tpu.memory_space<vmem>>, vector<1x128xf32>
    %24 = vector.broadcast %23 : vector<1x128xf32> to vector<256x128xf32>
    %25 = arith.addf %22, %24 : vector<256x128xf32>
    %c0_32 = arith.constant 0 : index
    %c0_33 = arith.constant 0 : index
    %26 = vector.load %arg7[%c0_32, %c0_33] : memref<256x32xbf16, #tpu.memory_space<vmem>>, vector<256x32xbf16>
    %27 = arith.extf %26 : vector<256x32xbf16> to vector<256x32xf32>
    %cst_34 = arith.constant 0.000000e+00 : f32
    %28 = vector.broadcast %cst_34 : f32 to vector<256x96xf32>
    %29 = tpu.concatenate %27, %28 in 1 : vector<256x32xf32>, vector<256x96xf32> -> vector<256x128xf32>
    %30 = arith.addf %25, %29 : vector<256x128xf32>
    %cst_35 = arith.constant 0.000000e+00 : f32
    %31 = vector.broadcast %cst_35 : f32 to vector<256x128xf32>
    %32 = arith.maximumf %30, %31 : vector<256x128xf32>
    %33 = arith.truncf %32 : vector<256x128xf32> to vector<256x128xbf16>
    %c0_36 = arith.constant 0 : index
    %c0_37 = arith.constant 0 : index
    %34 = vector.load %arg8[%c0_36, %c0_37] : memref<256x128xbf16, #tpu.memory_space<vmem>>, vector<256x128xbf16>
    tpu.vector_store %arg8[%c0_36, %c0_37], %33 {strides = array<i32>} : memref<256x128xbf16, #tpu.memory_space<vmem>>, vector<256x128xbf16>,
    return
  }
  func.func @transform_0(%arg0: i32, %arg1: i32) -> (i32, i32, i32) {
    %c0_i32 = arith.constant 0 : i32
    %c0_i32_0 = arith.constant 0 : i32
    %c0_i32_1 = arith.constant 0 : i32
    return %arg1, %c0_i32, %c0_i32_0 : i32, i32, i32
  }
  func.func @transform_1(%arg0: i32, %arg1: i32) -> (i32, i32, i32) {
    %c0_i32 = arith.constant 0 : i32
    %c0_i32_0 = arith.constant 0 : i32
    %c0_i32_1 = arith.constant 0 : i32
    return %arg1, %c0_i32, %c0_i32_0 : i32, i32, i32
  }
  func.func @transform_2(%arg0: i32, %arg1: i32) -> (i32, i32, i32) {
    %c0_i32 = arith.constant 0 : i32
    %c0_i32_0 = arith.constant 0 : i32
    %c0_i32_1 = arith.constant 0 : i32
    return %arg1, %c0_i32, %c0_i32_0 : i32, i32, i32
  }
  func.func @transform_3(%arg0: i32, %arg1: i32) -> (i32, i32) {
    %c0_i32 = arith.constant 0 : i32
    %c0_i32_0 = arith.constant 0 : i32
    return %c0_i32, %arg0 : i32, i32
  }
  func.func @transform_4(%arg0: i32, %arg1: i32) -> (i32, i32) {
    %c0_i32 = arith.constant 0 : i32
    %c0_i32_0 = arith.constant 0 : i32
    return %c0_i32, %arg0 : i32, i32
  }
  func.func @transform_5(%arg0: i32, %arg1: i32) -> (i32, i32) {
    %c0_i32 = arith.constant 0 : i32
    %c0_i32_0 = arith.constant 0 : i32
    return %arg1, %c0_i32 : i32, i32
  }
  func.func @transform_6(%arg0: i32, %arg1: i32) -> (i32, i32) {
    %c0_i32 = arith.constant 0 : i32
    return %arg1, %arg0 : i32, i32
  }
}

</mosaic_0001>

<bundles_post_ra>
// kernel: tpu_custom_call.1
= control target key start
LH: loop header
LB: loop body
LE: loop exit
PB: predicated region body
PF: predicated region fallthrough
CT: control target
= control target key end

     0   :  { %vm490_vm0 = vcmask 1046528   ;;  %vm217_vm1 = vsmask.f32 7424  ;;  %s3903_s17 = smov 64   ;;  %s3904_s12 = smov 32   ;;  %vm571_vm2 = vcmask 261120   ;;  %s5588_s0 = inlined_call_operand.vmem [shape: bf16[16,18,32], index: 0, kind: input, shape index: {}]   ;;  %s5589_s1 = inlined_call_operand.vmem [shape: bf16[16,18,32], index: 1, kind: input, shape index: {}]   ;;  %s5590_s2 = inlined_call_operand.vmem [shape: bf16[16,18,32], index: 2, kind: input, shape index: {}]   ;;  %s5591_s3 = inlined_call_operand.vmem [shape: bf16[288,128], index: 3, kind: input, shape index: {}]   ;;  %s5592_s4 = inlined_call_operand.vmem [shape: f32[1,128], index: 4, kind: input, shape index: {}]   ;;  %s5593_s5 = inlined_call_operand.vmem [shape: bf16[256,32], index: 5, kind: input, shape index: {}]   ;;  %s5594_s6 = inlined_call_operand.hbm [shape: bf16[256,128], index: 6, kind: output, shape index: {}]  }
   0x1   :  { %v26_v0 = vld [vmem:[%s5588_s0 + $0x4] sm:$0xf]  ;;  %v73_v1 = vld [vmem:[%s5588_s0] sm:$0xe]  ;;  %v27_v18 = vld [vmem:[%s5588_s0 + $0xc] sm:$0xf] }
   0x2   :  { %v3711_v2 = vld [vmem:[%s5588_s0 + $0x8] ss:$0 sps:$4 sm:$0x11]   ;;  %v3016_v3 = vcombine.low %v73_v1, %v26_v0  ;;  %v25_v4 = vld [vmem:[%s5588_s0] sm:$0xf]  ;;  %v3791_v24 = vld [vmem:[%s5591_s3 + $0x30] sm:$0xff]  }
   0x3   :  { %v649_v5 = vld [vmem:[%s5589_s1] sm:$0xf]  ;;  %v650_v6 = vld [vmem:[%s5589_s1 + $0x4] sm:$0xf]  ;;  %v492_v8 = vrot.slane %v3711_v2, 1  ;;  %v3960_v9 = vcombine.low %v25_v4, %v26_v0  ;;  %v226_v14 = vshll.u32 %v3711_v2, 16  ;;  %3499 = vmatprep.subr.bf16.mxu1 %v3791_v24 }
   0x4   :  { %v491_v7 = vrot.slane %v3016_v3, 1  ;;  %v697_v10 = vld [vmem:[%s5589_s1] sm:$0xe]  ;;  %v3965_v11 = vcombine.low %v649_v5, %v650_v6  ;;  %v3715_v12 = vld [vmem:[%s5589_s1 + $0x8] ss:$0 sps:$4 sm:$0x11]   ;;  %3500 = vmatpush3.bf16.msra.mxu1 %v3791_v24 }
   0x5   :  { %v3064_v13 = vcombine.low %v697_v10, %v650_v6  ;;  %v219_v16 = vshrl.u32 %v3960_v9, 16  ;;  %v221_v17 = vshll.u32 %v3960_v9, 16  ;;  %v3979_v19 = vld [vmem:[%s5588_s0 + $0x10] sm:$0xf]  ;;  %v1114_v21 = vrot.slane %v3715_v12, 1  ;;  %v4004_v34 = vld [vmem:[%s5591_s3] sm:$0xff]  }
   0x6   :  { %v493_v15 = vsel %vm490_vm0, %v491_v7, %v492_v8  ;;  %v228_v22 = vrot.slane %v226_v14, 1  ;;  %v3983_v23 = vcombine.low %v27_v18, %v3979_v19  ;;  %v3991_v26 = vld [vmem:[%s5588_s0 + $0x14] ss:$0 sps:$4 sm:$0x11]   ;;  %v842_v27 = vshrl.u32 %v3965_v11, 16  ;;  %3543 = vmatprep.subr.bf16.mxu0 %v4004_v34  ;;  %v3796_v1 = vld [vmem:[%s5591_s3 + $0x38] sm:$0xff]  }
   0x7   :  { %539 = vrot.lane.b32.xlu1 %v493_v15, %s3903_s17  ;;  %v1113_v20 = vrot.slane %v3064_v13, 1  ;;  %v223_v25 = vrot.slane %v221_v17, 1  ;;  %v844_v28 = vshll.u32 %v3965_v11, 16  ;;  %v849_v32 = vshll.u32 %v3715_v12, 16  ;;  %v651_v33 = vld [vmem:[%s5589_s1 + $0xc] sm:$0xf]  ;;  %3544 = vmatpush3.bf16.msra.mxu0 %v4004_v34 }
   0x8   :  { %v231_v30 = vshrl.u32 %v3983_v23, 16  ;;  %v233_v31 = vshll.u32 %v3983_v23, 16  ;;  %v238_v36 = vshll.u32 %v3991_v26, 16  ;;  %v652_v38 = vld [vmem:[%s5589_s1 + $0x10] sm:$0xf]  ;;  %v495_v10 = vrot.slane %v3991_v26, 1  ;;  %3501 = vmatprep.subr.bf16.mxu1 %v3796_v1 }
   0x9   :  { %v1115_v29 = vsel %vm490_vm0, %v1113_v20, %v1114_v21  ;;  %v224_v35 = vor.u32 %v223_v25, %v219_v16  ;;  %v846_v37 = vrot.slane %v844_v28, 1  ;;  %v851_v40 = vrot.slane %v849_v32, 1  ;;  %v698_v41 = vld [vmem:[%s5589_s1 + $0xc] sm:$0xe]  ;;  %v653_v43 = vld [vmem:[%s5589_s1 + $0x18] sm:$0xf]  ;;  %3502 = vmatpush3.bf16.msra.mxu1 %v3796_v1 }
   0xa   :  { %v235_v39 = vrot.slane %v233_v31, 1  ;;  %v4014_v42 = vcombine.low %v651_v33, %v652_v38  ;;  %v240_v45 = vrot.slane %v238_v36, 1  ;;  %v3720_v47 = vld [vmem:[%s5589_s1 + $0x14] ss:$0 sps:$4 sm:$0x11]   ;;  %v3065_v48 = vcombine.low %v698_v41, %v652_v38  ;;  %v3797_v20 = vld [vmem:[%s5591_s3 + $0x8] sm:$0xff]  }
   0xb   :  { %1161 = vrot.lane.b32.xlu1 %v1115_v29, %s3903_s17  ;;  %v229_v44 = vsel %vm217_vm1, %v224_v35, %v228_v22  ;;  %v847_v46 = vor.u32 %v846_v37, %v842_v27  ;;  %v654_v49 = vld [vmem:[%s5589_s1 + $0x1c] sm:$0xf]  ;;  %v74_v54 = vld [vmem:[%s5588_s0 + $0xc] sm:$0xe]  ;;  %v1117_v57 = vrot.slane %v3720_v47, 1  ;;  %v861_v58 = vshll.u32 %v3720_v47, 16  ;;  %3545 = vmatprep.subr.bf16.mxu0 %v3797_v20 }
   0xc   :  { %410 = vrot.lane.b32.xlu0 %v229_v44, %s3904_s12  ;;  %v236_v50 = vor.u32 %v235_v39, %v231_v30  ;;  %v854_v51 = vshrl.u32 %v4014_v42, 16  ;;  %v856_v52 = vshll.u32 %v4014_v42, 16  ;;  %v4031_v53 = vcombine.low %v653_v43, %v654_v49  ;;  %v4040_v59 = vld [vmem:[%s5589_s1 + $0x20] ss:$0 sps:$4 sm:$0x11]   ;;  %3546 = vmatpush3.bf16.msra.mxu0 %v3797_v20  ;;  %v3802_v43 = vld [vmem:[%s5591_s3 + $0x10] sm:$0xff]  }
   0xd   :  { %v852_v55 = vsel %vm217_vm1, %v847_v46, %v851_v40  ;;  %v1116_v56 = vrot.slane %v3065_v48, 1  ;;  %v29_v0 = vld [vmem:[%s5588_s0 + $0x18] sm:$0xf]  ;;  %v863_v3 = vrot.slane %v861_v58, 1  ;;  %v873_v4 = vshll.u32 %v4040_v59, 16  ;;  %v3801_v30 = vld [vmem:[%s5591_s3 + $0x40] sm:$0xff]   ;;  %3547 = vmatprep.subr.bf16.mxu0 %v3802_v43 }
   0xe   :  { %v241_v60 = vsel %vm217_vm1, %v236_v50, %v240_v45  ;;  %v858_v61 = vrot.slane %v856_v52, 1  ;;  %v866_v62 = vshrl.u32 %v4031_v53, 16  ;;  %v868_v63 = vshll.u32 %v4031_v53, 16  ;;  %v30_v6 = vld [vmem:[%s5588_s0 + $0x1c] sm:$0xf]  ;;  %3503 = vmatprep.subr.bf16.mxu1 %v3801_v30  ;;  %v3806_v48 = vld [vmem:[%s5591_s3 + $0x48] sm:$0xff]  }
   0xf   :  { %412 = vrot.lane.b32.xlu1 %v241_v60, %s3904_s12  ;;  %v1118_v2 = vsel %vm490_vm0, %v1116_v56, %v1117_v57  ;;  %v3017_v5 = vcombine.low %v74_v54, %v3979_v19  ;;  %v75_v12 = vld [vmem:[%s5588_s0 + $0x18] sm:$0xe]  ;;  %v4063_v13 = vcombine.low %v29_v0, %v30_v6  ;;  %v875_v15 = vrot.slane %v873_v4, 1  ;;  %v3726_v17 = vld [vmem:[%s5588_s0 + $0x20] ss:$0 sps:$4 sm:$0x11]   ;;  %3504 = vmatpush3.bf16.msra.mxu1 %v3801_v30 }
  0x10   :  { %1033 = vrot.lane.b32.xlu0 %v852_v55, %s3904_s12  ;;  %v859_v7 = vor.u32 %v858_v61, %v854_v51  ;;  %v870_v8 = vrot.slane %v868_v63, 1  ;;  %v699_v14 = vld [vmem:[%s5589_s1 + $0x18] sm:$0xe]  ;;  %v3018_v18 = vcombine.low %v75_v12, %v30_v6  ;;  %v31_v26 = vld [vmem:[%s5588_s0 + $0x24] sm:$0xf]  ;;  %v250_v29 = vshll.u32 %v3726_v17, 16  ;;  %3505 = vmatprep.subr.bf16.mxu1 %v3806_v48 }
  0x11   :  { %v494_v16 = vrot.slane %v3017_v5, 1  ;;  %v3066_v19 = vcombine.low %v699_v14, %v654_v49  ;;  %v243_v24 = vshrl.u32 %v4063_v13, 16  ;;  %v245_v25 = vshll.u32 %v4063_v13, 16  ;;  %v4083_v27 = vld [vmem:[%s5588_s0 + $0x28] sm:$0xf]  ;;  %v3807_v60 = vld [vmem:[%s5591_s3 + $0x18] sm:$0xff]   ;;  %3548 = vmatpush3.bf16.msra.mxu0 %v3802_v43 }
  0x12   :  { %v864_v21 = vsel %vm217_vm1, %v859_v7, %v863_v3  ;;  %v871_v22 = vor.u32 %v870_v8, %v866_v62  ;;  %v497_v28 = vrot.slane %v3018_v18, 1  ;;  %v498_v32 = vrot.slane %v3726_v17, 1  ;;  %v4094_v36 = vld [vmem:[%s5588_s0 + $0x2c] ss:$0 sps:$4 sm:$0x11]   ;;  %3549 = vmatprep.subr.bf16.mxu0 %v3807_v60 }
  0x13   :  { %1163 = vrot.lane.b32.xlu1 %v1118_v2, %s3903_s17  ;;  %v247_v33 = vrot.slane %v245_v25, 1  ;;  %v1119_v35 = vrot.slane %v3066_v19, 1  ;;  %v496_v37 = vsel %vm490_vm0, %v494_v16, %v495_v10  ;;  %v252_v38 = vrot.slane %v250_v29, 1  ;;  %v655_v40 = vld [vmem:[%s5589_s1 + $0x24] sm:$0xf]  ;;  %3506 = vmatpush3.bf16.msra.mxu1 %v3806_v48  ;;  %v3811_v19 = vld [vmem:[%s5591_s3 + $0x50] sm:$0xff]  }
  0x14   :  { %1035 = vrot.lane.b32.xlu0 %v864_v21, %s3904_s12  ;;  %v876_v31 = vsel %vm217_vm1, %v871_v22, %v875_v15  ;;  %v4098_v39 = vcombine.low %v31_v26, %v4083_v27  ;;  %v656_v41 = vld [vmem:[%s5589_s1 + $0x28] sm:$0xf]  ;;  %v262_v45 = vshll.u32 %v4094_v36, 16  ;;  %v700_v46 = vld [vmem:[%s5589_s1 + $0x24] sm:$0xe]  ;;  %v1120_v49 = vrot.slane %v4040_v59, 1  ;;  %3507 = vmatprep.subr.bf16.mxu1 %v3811_v19 }
  0x15   :  { %v248_v44 = vor.u32 %v247_v33, %v243_v24  ;;  %v4113_v47 = vcombine.low %v655_v40, %v656_v41  ;;  %v3732_v52 = vld [vmem:[%s5589_s1 + $0x2c] ss:$0 sps:$4 sm:$0x11]   ;;  %v3067_v54 = vcombine.low %v700_v46, %v656_v41  ;;  %v499_v55 = vsel %vm490_vm0, %v497_v28, %v498_v32  ;;  %v657_v59 = vld [vmem:[%s5589_s1 + $0x30] sm:$0xf]  ;;  %3550 = vmatpush3.bf16.msra.mxu0 %v3807_v60 }
  0x16   :  { %v255_v50 = vshrl.u32 %v4098_v39, 16  ;;  %v257_v51 = vshll.u32 %v4098_v39, 16  ;;  %v264_v62 = vrot.slane %v262_v45, 1  ;;  %v885_v0 = vshll.u32 %v3732_v52, 16  ;;  %v4139_v1 = vld [vmem:[%s5589_s1 + $0x34] sm:$0xf] }
  0x17   :  { %1037 = vrot.lane.b32.xlu1 %v876_v31, %s3904_s12  ;;  %v253_v56 = vsel %vm217_vm1, %v248_v44, %v252_v38  ;;  %v878_v57 = vshrl.u32 %v4113_v47, 16  ;;  %v880_v58 = vshll.u32 %v4113_v47, 16  ;;  %v1122_v63 = vrot.slane %v3067_v54, 1  ;;  %v4147_v4 = vld [vmem:[%s5589_s1 + $0x38] ss:$0 sps:$4 sm:$0x11]   ;;  %3508 = vmatpush3.bf16.msra.mxu1 %v3811_v19 }
  0x18   :  { %541 = vrot.lane.b32.xlu0 %v496_v37, %s3903_s17  ;;  %v259_v61 = vrot.slane %v257_v51, 1  ;;  %v4142_v3 = vcombine.low %v657_v59, %v4139_v1  ;;  %v1121_v5 = vsel %vm490_vm0, %v1119_v35, %v1120_v49  ;;  %v1123_v7 = vrot.slane %v3732_v52, 1  ;;  %v76_v10 = vld [vmem:[%s5588_s0 + $0x24] sm:$0xe]  ;;  %v33_v12 = vld [vmem:[%s5588_s0 + $0x30] sm:$0xf] }
  0x19   :  { %v882_v2 = vrot.slane %v880_v58, 1  ;;  %v887_v8 = vrot.slane %v885_v0, 1  ;;  %v897_v17 = vshll.u32 %v4147_v4, 16  ;;  %v34_v18 = vld [vmem:[%s5588_s0 + $0x34] sm:$0xf]  ;;  %v3019_v21 = vcombine.low %v76_v10, %v4083_v27  ;;  %v3812_v27 = vld [vmem:[%s5591_s3 + $0x20] sm:$0xff]  }
  0x1a   :  { %v260_v6 = vor.u32 %v259_v61, %v255_v50  ;;  %v890_v15 = vshrl.u32 %v4142_v3, 16  ;;  %v892_v16 = vshll.u32 %v4142_v3, 16  ;;  %v77_v22 = vld [vmem:[%s5588_s0 + $0x30] sm:$0xe]  ;;  %v4172_v24 = vcombine.low %v33_v12, %v34_v18  ;;  %v35_v35 = vld [vmem:[%s5588_s0 + $0x3c] sm:$0xf]  ;;  %3551 = vmatprep.subr.bf16.mxu0 %v3812_v27 }
  0x1b   :  { %543 = vrot.lane.b32.xlu1 %v499_v55, %s3903_s17  ;;  %v883_v14 = vor.u32 %v882_v2, %v878_v57  ;;  %v701_v25 = vld [vmem:[%s5589_s1 + $0x30] sm:$0xe]  ;;  %v501_v28 = vrot.slane %v4094_v36, 1  ;;  %v3738_v29 = vld [vmem:[%s5588_s0 + $0x38] ss:$0 sps:$4 sm:$0x11]   ;;  %v3020_v30 = vcombine.low %v77_v22, %v34_v18  ;;  %v1124_v37 = vsel %vm490_vm0, %v1122_v63, %v1123_v7  ;;  %3552 = vmatpush3.bf16.msra.mxu0 %v3812_v27 }
  0x1c   :  { %414 = vrot.lane.b32.xlu0 %v253_v56, %s3904_s12  ;;  %v265_v20 = vsel %vm217_vm1, %v260_v6, %v264_v62  ;;  %v894_v26 = vrot.slane %v892_v16, 1  ;;  %v899_v31 = vrot.slane %v897_v17, 1  ;;  %v267_v32 = vshrl.u32 %v4172_v24, 16  ;;  %v3816_v36 = vld [vmem:[%s5591_s3 + $0x58] sm:$0xff]   ;;  %v4199_v43 = vld [vmem:[%s5588_s0 + $0x40] sm:$0xf] }
  0x1d   :  { %v269_v33 = vshll.u32 %v4172_v24, 16  ;;  %v888_v38 = vsel %vm217_vm1, %v883_v14, %v887_v8  ;;  %v274_v41 = vshll.u32 %v3738_v29, 16  ;;  %v3817_v44 = vld [vmem:[%s5591_s3 + $0x28] sm:$0xff]   ;;  %v500_v45 = vrot.slane %v3019_v21, 1  ;;  %3509 = vmatprep.subr.bf16.mxu1 %v3816_v36  ;;  %v659_v55 = vld [vmem:[%s5589_s1 + $0x3c] sm:$0xf] }
  0x1e   :  { %v895_v40 = vor.u32 %v894_v26, %v890_v15  ;;  %v503_v46 = vrot.slane %v3020_v30, 1  ;;  %v504_v48 = vrot.slane %v3738_v29, 1  ;;  %v3068_v51 = vcombine.low %v701_v25, %v4139_v1  ;;  %v4211_v54 = vld [vmem:[%s5588_s0 + $0x44] ss:$0 sps:$4 sm:$0x11]   ;;  %3553 = vmatprep.subr.bf16.mxu0 %v3817_v44  ;;  %3510 = vmatpush3.bf16.msra.mxu1 %v3816_v36 }
  0x1f   :  { %1165 = vrot.lane.b32.xlu1 %v1121_v5, %s3903_s17  ;;  %v271_v49 = vrot.slane %v269_v33, 1  ;;  %v276_v50 = vrot.slane %v274_v41, 1  ;;  %v4206_v52 = vcombine.low %v35_v35, %v4199_v43  ;;  %v660_v58 = vld [vmem:[%s5589_s1 + $0x40] sm:$0xf]  ;;  %v702_v59 = vld [vmem:[%s5589_s1 + $0x3c] sm:$0xe]  ;;  %3631 = vmatprep.subr.bf16.mxu1 %v4004_v34  ;;  %v502_v1 = vsel %vm490_vm0, %v500_v45, %v501_v28 }
  0x20   :  { %416 = vrot.lane.b32.xlu0 %v265_v20, %s3904_s12  ;;  %v900_v56 = vsel %vm217_vm1, %v895_v40, %v899_v31  ;;  %v286_v62 = vshll.u32 %v4211_v54, 16  ;;  %v4228_v63 = vcombine.low %v659_v55, %v660_v58  ;;  %v3744_v0 = vld [vmem:[%s5589_s1 + $0x44] ss:$0 sps:$4 sm:$0x11]   ;;  %v661_v2 = vld [vmem:[%s5589_s1 + $0x48] sm:$0xf]  ;;  %3554 = vmatpush3.bf16.msra.mxu0 %v3817_v44  ;;  %v3069_v17 = vcombine.low %v702_v59, %v660_v58 }
  0x21   :  { %v272_v57 = vor.u32 %v271_v49, %v267_v32  ;;  %v279_v60 = vshrl.u32 %v4206_v52, 16  ;;  %v281_v61 = vshll.u32 %v4206_v52, 16  ;;  %v4241_v5 = vld [vmem:[%s5589_s1 + $0x4c] sm:$0xf]  ;;  %v1125_v6 = vrot.slane %v3068_v51, 1 }
  0x22   :  { %v1126_v7 = vrot.slane %v4147_v4, 1  ;;  %v904_v34 = vshll.u32 %v4228_v63, 16  ;;  %v4247_v10 = vcombine.low %v661_v2, %v4241_v5  ;;  %v4252_v12 = vld [vmem:[%s5589_s1 + $0x50] ss:$0 sps:$4 sm:$0x11]   ;;  %v505_v4 = vsel %vm490_vm0, %v503_v46, %v504_v48 }
  0x23   :  { %1167 = vrot.lane.b32.xlu1 %v1124_v37, %s3903_s17  ;;  %v283_v8 = vrot.slane %v281_v61, 1  ;;  %v78_v14 = vld [vmem:[%s5588_s0 + $0x3c] sm:$0xe]  ;;  %v277_v15 = vsel %vm217_vm1, %v272_v57, %v276_v50  ;;  %v288_v16 = vrot.slane %v286_v62, 1  ;;  %v37_v18 = vld [vmem:[%s5588_s0 + $0x48] sm:$0xf] }
  0x24   :  { %1039 = vrot.lane.b32.xlu0 %v888_v38, %s3904_s12  ;;  %v38_v19 = vld [vmem:[%s5588_s0 + $0x4c] sm:$0xf]  ;;  %v902_v21 = vshrl.u32 %v4228_v63, 16  ;;  %v906_v22 = vrot.slane %v904_v34, 1  ;;  %v909_v25 = vshll.u32 %v3744_v0, 16  ;;  %v1129_v26 = vrot.slane %v3744_v0, 1 }
  0x25   :  { %v284_v20 = vor.u32 %v283_v8, %v279_v60  ;;  %v916_v28 = vshll.u32 %v4247_v10, 16  ;;  %v921_v29 = vshll.u32 %v4252_v12, 16  ;;  %v3021_v30 = vcombine.low %v78_v14, %v4199_v43  ;;  %v79_v31 = vld [vmem:[%s5588_s0 + $0x48] sm:$0xe]  ;;  %v39_v38 = vld [vmem:[%s5588_s0 + $0x54] sm:$0xf] }
  0x26   :  { %v914_v27 = vshrl.u32 %v4247_v10, 16  ;;  %v4275_v32 = vcombine.low %v37_v18, %v38_v19  ;;  %v3750_v33 = vld [vmem:[%s5588_s0 + $0x50] ss:$0 sps:$4 sm:$0x11]   ;;  %v1127_v35 = vsel %vm490_vm0, %v1125_v6, %v1126_v7  ;;  %v1128_v36 = vrot.slane %v3069_v17, 1 }
  0x27   :  { %1041 = vrot.lane.b32.xlu1 %v900_v56, %s3904_s12  ;;  %v918_v37 = vrot.slane %v916_v28, 1  ;;  %v4288_v40 = vld [vmem:[%s5588_s0 + $0x58] sm:$0xf]  ;;  %v289_v41 = vsel %vm217_vm1, %v284_v20, %v288_v16  ;;  %v907_v43 = vor.u32 %v906_v22, %v902_v21  ;;  %v911_v44 = vrot.slane %v909_v25, 1  ;;  %v703_v46 = vld [vmem:[%s5589_s1 + $0x48] sm:$0xe] }
  0x28   :  { %545 = vrot.lane.b32.xlu0 %v502_v1, %s3903_s17  ;;  %v507_v45 = vrot.slane %v4211_v54, 1  ;;  %v923_v48 = vrot.slane %v921_v29, 1  ;;  %v506_v49 = vrot.slane %v3021_v30, 1  ;;  %v293_v50 = vshll.u32 %v4275_v32, 16  ;;  %v663_v54 = vld [vmem:[%s5589_s1 + $0x54] sm:$0xf] }
  0x29   :  { %v4299_v51 = vld [vmem:[%s5588_s0 + $0x5c] ss:$0 sps:$4 sm:$0x11]   ;;  %v919_v55 = vor.u32 %v918_v37, %v914_v27  ;;  %v3022_v56 = vcombine.low %v79_v31, %v38_v19  ;;  %v4303_v57 = vcombine.low %v39_v38, %v4288_v40  ;;  %v664_v58 = vld [vmem:[%s5589_s1 + $0x58] sm:$0xf]  ;;  %v1130_v59 = vsel %vm490_vm0, %v1128_v36, %v1129_v26  ;;  %v4349_v29 = vld [vmem:[%s5591_s3 + $0x60] sm:$0xff]  }
  0x2a   :  { %v291_v60 = vshrl.u32 %v4275_v32, 16  ;;  %v295_v61 = vrot.slane %v293_v50, 1  ;;  %v298_v62 = vshll.u32 %v3750_v33, 16  ;;  %v912_v0 = vsel %vm217_vm1, %v907_v43, %v911_v44  ;;  %v704_v2 = vld [vmem:[%s5589_s1 + $0x54] sm:$0xe]  ;;  %3587 = vmatprep.subr.bf16.mxu0 %v4349_v29 }
  0x2b   :  { %547 = vrot.lane.b32.xlu1 %v505_v4, %s3903_s17  ;;  %v305_v1 = vshll.u32 %v4303_v57, 16  ;;  %v4319_v6 = vcombine.low %v663_v54, %v664_v58  ;;  %v4324_v7 = vld [vmem:[%s5589_s1 + $0x5c] ss:$0 sps:$4 sm:$0x11]   ;;  %v508_v8 = vsel %vm490_vm0, %v506_v49, %v507_v45  ;;  %v3070_v34 = vcombine.low %v703_v46, %v4241_v5  ;;  %v1728_v14 = vld [vmem:[%s5590_s2] sm:$0xf] }
  0x2c   :  { %418 = vrot.lane.b32.xlu0 %v277_v15, %s3904_s12  ;;  %v4334_v4 = vld [vmem:[%s5590_s2 + $0x4] sm:$0xf]  ;;  %v924_v15 = vsel %vm217_vm1, %v919_v55, %v923_v48  ;;  %v509_v16 = vrot.slane %v3022_v56, 1  ;;  %v510_v17 = vrot.slane %v3750_v33, 1  ;;  %v310_v18 = vshll.u32 %v4299_v51, 16 }
  0x2d   :  { %v296_v5 = vor.u32 %v295_v61, %v291_v60  ;;  %v300_v19 = vrot.slane %v298_v62, 1  ;;  %v303_v20 = vshrl.u32 %v4303_v57, 16  ;;  %v3071_v21 = vcombine.low %v704_v2, %v664_v58  ;;  %v665_v27 = vld [vmem:[%s5589_s1 + $0x60] sm:$0xf]  ;;  %v666_v31 = vld [vmem:[%s5589_s1 + $0x64] sm:$0xf] }
  0x2e   :  { %v307_v22 = vrot.slane %v305_v1, 1  ;;  %v928_v25 = vshll.u32 %v4319_v6, 16  ;;  %v933_v26 = vshll.u32 %v4324_v7, 16  ;;  %v4344_v28 = vcombine.low %v1728_v14, %v4334_v4  ;;  %v80_v49 = vld [vmem:[%s5588_s0 + $0x54] sm:$0xe] }
  0x2f   :  { %1169 = vrot.lane.b32.xlu1 %v1127_v35, %s3903_s17  ;;  %v1132_v30 = vrot.slane %v4252_v12, 1  ;;  %v511_v33 = vsel %vm490_vm0, %v509_v16, %v510_v17  ;;  %v1131_v35 = vrot.slane %v3070_v34, 1  ;;  %v312_v36 = vrot.slane %v310_v18, 1  ;;  %v4364_v12 = vld [vmem:[%s5590_s2 + $0x8] ss:$0 sps:$4 sm:$0x11]  }
  0x30   :  { %420 = vrot.lane.b32.xlu0 %v289_v41, %s3904_s12  ;;  %v1135_v37 = vrot.slane %v4324_v7, 1  ;;  %v301_v38 = vsel %vm217_vm1, %v296_v5, %v300_v19  ;;  %v1134_v41 = vrot.slane %v3071_v21, 1  ;;  %v926_v43 = vshrl.u32 %v4319_v6, 16  ;;  %v667_v55 = vld [vmem:[%s5589_s1 + $0x6c] sm:$0xf] }
  0x31   :  { %v1923_v44 = vshll.u32 %v4344_v28, 16  ;;  %v308_v45 = vor.u32 %v307_v22, %v303_v20  ;;  %v930_v46 = vrot.slane %v928_v25, 1  ;;  %v935_v48 = vrot.slane %v933_v26, 1  ;;  %v4382_v56 = vld [vmem:[%s5589_s1 + $0x70] sm:$0xf] }
  0x32   :  { %v4374_v50 = vcombine.low %v665_v27, %v666_v31  ;;  %v1928_v54 = vshll.u32 %v4364_v12, 16  ;;  %v705_v58 = vld [vmem:[%s5589_s1 + $0x60] sm:$0xe]  ;;  %v1133_v60 = vsel %vm490_vm0, %v1131_v35, %v1132_v30  ;;  %v1921_v61 = vshrl.u32 %v4344_v28, 16  ;;  %v1730_v1 = vld [vmem:[%s5590_s2 + $0xc] sm:$0xf] }
  0x33   :  { %1171 = vrot.lane.b32.xlu1 %v1130_v59, %s3903_s17  ;;  %v3762_v59 = vld [vmem:[%s5589_s1 + $0x68] ss:$0 sps:$4 sm:$0x11]   ;;  %v1925_v62 = vrot.slane %v1923_v44, 1  ;;  %v1731_v2 = vld [vmem:[%s5590_s2 + $0x10] sm:$0xf]  ;;  %v313_v7 = vsel %vm217_vm1, %v308_v45, %v312_v36  ;;  %v4405_v14 = vcombine.low %v667_v55, %v4382_v56  ;;  %v3072_v16 = vcombine.low %v705_v58, %v666_v31 }
  0x34   :  { %1043 = vrot.lane.b32.xlu0 %v912_v0, %s3904_s12  ;;  %v3023_v0 = vcombine.low %v80_v49, %v4288_v40  ;;  %v940_v34 = vshll.u32 %v4374_v50, 16  ;;  %v945_v40 = vshll.u32 %v3762_v59, 16  ;;  %v1776_v17 = vld [vmem:[%s5590_s2] sm:$0xe]  ;;  %v4417_v5 = vcombine.low %v1730_v1, %v1731_v2  ;;  %v1732_v22 = vld [vmem:[%s5590_s2 + $0x18] sm:$0xf] }
  0x35   :  { %v4415_v18 = vld [vmem:[%s5589_s1 + $0x74] ss:$0 sps:$4 sm:$0x11]   ;;  %v1136_v19 = vsel %vm490_vm0, %v1134_v41, %v1135_v37  ;;  %v1930_v20 = vrot.slane %v1928_v54, 1  ;;  %v4427_v25 = vld [vmem:[%s5590_s2 + $0x1c] sm:$0xf]  ;;  %v3156_v36 = vcombine.low %v1776_v17, %v4334_v4 }
  0x36   :  { %v512_v21 = vrot.slane %v3023_v0, 1  ;;  %v938_v30 = vshrl.u32 %v4374_v50, 16  ;;  %v942_v27 = vrot.slane %v940_v34, 1  ;;  %v952_v31 = vshll.u32 %v4405_v14, 16  ;;  %v1777_v37 = vld [vmem:[%s5590_s2 + $0xc] sm:$0xe] }
  0x37   :  { %1045 = vrot.lane.b32.xlu1 %v924_v15, %s3904_s12  ;;  %v513_v15 = vrot.slane %v4299_v51, 1  ;;  %v1926_v51 = vor.u32 %v1925_v62, %v1921_v61  ;;  %v1138_v35 = vrot.slane %v3762_v59, 1  ;;  %v957_v41 = vshll.u32 %v4415_v18, 16  ;;  %v670_v49 = vld [vmem:[%s5589_s1 + $0x7c] sm:$0xf] }
  0x38   :  { %549 = vrot.lane.b32.xlu0 %v508_v8, %s3903_s17  ;;  %v931_v8 = vor.u32 %v930_v46, %v926_v43  ;;  %v4441_v43 = vld [vmem:[%s5590_s2 + $0x14] ss:$0 sps:$4 sm:$0x11]   ;;  %v1935_v44 = vshll.u32 %v4417_v5, 16  ;;  %v4445_v45 = vcombine.low %v1732_v22, %v4427_v25  ;;  %v943_v55 = vor.u32 %v942_v27, %v938_v30 }
  0x39   :  { %v1931_v4 = vsel %vm217_vm1, %v1926_v51, %v1930_v20  ;;  %v514_v46 = vsel %vm490_vm0, %v512_v21, %v513_v15  ;;  %v950_v54 = vshrl.u32 %v4405_v14, 16  ;;  %v954_v58 = vrot.slane %v952_v31, 1  ;;  %v4462_v0 = vld [vmem:[%s5590_s2 + $0x20] ss:$0 sps:$4 sm:$0x11]  }
  0x3a   :  { %v936_v26 = vsel %vm217_vm1, %v931_v8, %v935_v48  ;;  %v669_v48 = vld [vmem:[%s5589_s1 + $0x78] sm:$0xf]  ;;  %v3157_v59 = vcombine.low %v1777_v37, %v1731_v2  ;;  %v2193_v61 = vrot.slane %v4364_v12, 1  ;;  %v1933_v62 = vshrl.u32 %v4417_v5, 16  ;;  %v706_v2 = vld [vmem:[%s5589_s1 + $0x6c] sm:$0xe] }
  0x3b   :  { %551 = vrot.lane.b32.xlu1 %v511_v33, %s3903_s17  ;;  %v1137_v33 = vrot.slane %v3072_v16, 1  ;;  %v1937_v1 = vrot.slane %v1935_v44, 1  ;;  %v1947_v8 = vshll.u32 %v4445_v45, 16  ;;  %v4470_v34 = vcombine.low %v669_v48, %v670_v49  ;;  %v671_v15 = vld [vmem:[%s5589_s1 + $0x84] sm:$0xf] }
  0x3c   :  { %422 = vrot.lane.b32.xlu0 %v301_v38, %s3904_s12  ;;  %v947_v38 = vrot.slane %v945_v40, 1  ;;  %v4480_v16 = vld [vmem:[%s5589_s1 + $0x88] sm:$0xf]  ;;  %v955_v17 = vor.u32 %v954_v58, %v950_v54  ;;  %v2195_v51 = vrot.slane %v3157_v59, 1  ;;  %v707_v20 = vld [vmem:[%s5589_s1 + $0x78] sm:$0xe]  ;;  %v3073_v22 = vcombine.low %v706_v2, %v4382_v56 }
  0x3d   :  { %v1139_v12 = vsel %vm490_vm0, %v1137_v33, %v1138_v35  ;;  %v1952_v21 = vshll.u32 %v4462_v0, 16  ;;  %v2196_v30 = vrot.slane %v4441_v43, 1  ;;  %v964_v31 = vshll.u32 %v4470_v34, 16  ;;  %v1778_v58 = vld [vmem:[%s5590_s2 + $0x18] sm:$0xe] }
  0x3e   :  { %v948_v40 = vsel %vm217_vm1, %v943_v55, %v947_v38  ;;  %v4495_v33 = vcombine.low %v671_v15, %v4480_v16  ;;  %v1945_v56 = vshrl.u32 %v4445_v45, 16  ;;  %v1949_v37 = vrot.slane %v1947_v8, 1  ;;  %v1734_v38 = vld [vmem:[%s5590_s2 + $0x24] sm:$0xf]  ;;  %v1736_v8 = vld [vmem:[%s5590_s2 + $0x30] sm:$0xf] }
  0x3f   :  { %1173 = vrot.lane.b32.xlu1 %v1133_v60, %s3903_s17  ;;  %v2192_v60 = vrot.slane %v3156_v36, 1  ;;  %v1938_v36 = vor.u32 %v1937_v1, %v1933_v62  ;;  %v3074_v44 = vcombine.low %v707_v20, %v670_v49  ;;  %v1140_v48 = vrot.slane %v3073_v22, 1  ;;  %v4533_v2 = vld [vmem:[%s5590_s2 + $0x34] sm:$0xf] }
  0x40   :  { %424 = vrot.lane.b32.xlu0 %v313_v7, %s3904_s12  ;;  %v1940_v7 = vshll.u32 %v4441_v43, 16  ;;  %v1141_v55 = vrot.slane %v4415_v18, 1  ;;  %v962_v59 = vshrl.u32 %v4470_v34, 16  ;;  %v976_v49 = vshll.u32 %v4495_v33, 16 }
  0x41   :  { %v2194_v35 = vsel %vm490_vm0, %v2192_v60, %v2193_v61  ;;  %v966_v60 = vrot.slane %v964_v31, 1  ;;  %v1779_v61 = vld [vmem:[%s5590_s2 + $0x24] sm:$0xe]  ;;  %v2197_v18 = vsel %vm490_vm0, %v2195_v51, %v2196_v30  ;;  %v2199_v51 = vrot.slane %v4462_v0, 1 }
  0x42   :  { %v1942_v27 = vrot.slane %v1940_v7, 1  ;;  %v1950_v7 = vor.u32 %v1949_v37, %v1945_v56  ;;  %v974_v20 = vshrl.u32 %v4495_v33, 16  ;;  %v978_v22 = vrot.slane %v976_v49, 1  ;;  %v674_v56 = vld [vmem:[%s5589_s1 + $0x94] sm:$0xf] }
  0x43   :  { %1175 = vrot.lane.b32.xlu1 %v1136_v19, %s3903_s17  ;;  %v959_v19 = vrot.slane %v957_v41, 1  ;;  %v1735_v41 = vld [vmem:[%s5590_s2 + $0x28] sm:$0xf]  ;;  %v1142_v31 = vsel %vm490_vm0, %v1140_v48, %v1141_v55  ;;  %vm604_vm3 = vcmask 523264   ;;  %vm1305_vm4 = vcmask 785408  }
  0x44   :  { %1047 = vrot.lane.b32.xlu0 %v936_v26, %s3904_s12  ;;  %v3774_v26 = vld [vmem:[%s5589_s1 + $0x80] ss:$0 sps:$4 sm:$0x11]   ;;  %v4522_v62 = vcombine.low %v1734_v38, %v1735_v41  ;;  %v1943_v1 = vsel %vm217_vm1, %v1938_v36, %v1942_v27  ;;  %v3159_v30 = vcombine.low %v1779_v61, %v1735_v41  ;;  %v673_v36 = vld [vmem:[%s5589_s1 + $0x90] sm:$0xf]  ;;  %v979_v48 = vor.u32 %v978_v22, %v974_v20 }
  0x45   :  { %v960_v43 = vsel %vm217_vm1, %v955_v17, %v959_v19  ;;  %v969_v54 = vshll.u32 %v3774_v26, 16  ;;  %v1144_v15 = vrot.slane %v3774_v26, 1  ;;  %v4545_v26 = vcombine.low %v1736_v8, %v4533_v2  ;;  %v675_v8 = vld [vmem:[%s5589_s1 + $0x9c] sm:$0xf]  ;;  %v1739_v22 = vld [vmem:[%s5590_s2 + $0x40] sm:$0xf] }
  0x46   :  { %v1959_v27 = vshll.u32 %v4522_v62, 16  ;;  %v2201_v55 = vrot.slane %v3159_v30, 1 }
  0x47   :  { %2112 = vrot.lane.b32.xlu1 %v1931_v4, %s3904_s12  ;;  %v4510_v4 = vld [vmem:[%s5589_s1 + $0x8c] ss:$0 sps:$4 sm:$0x11]   ;;  %v971_v19 = vrot.slane %v969_v54, 1  ;;  %5604 = vst [vmem:[#allocation5_spill] sm:$0xff] %v4545_v26  ;;  %v1971_v54 = vshll.u32 %v4545_v26, 16 }
  0x48   :  { %553 = vrot.lane.b32.xlu0 %v514_v46, %s3903_s17  ;;  %v1954_v46 = vrot.slane %v1952_v21, 1  ;;  %v981_v17 = vshll.u32 %v4510_v4, 16  ;;  %v3780_v21 = vld [vmem:[%s5590_s2 + $0x2c] ss:$0 sps:$4 sm:$0x11]   ;;  %v1147_v61 = vrot.slane %v4510_v4, 1 }
  0x49   :  { %v2202_v41 = vrot.slane %v3780_v21, 1  ;;  %v3786_v4 = vld [vmem:[%s5589_s1 + $0x98] ss:$0 sps:$4 sm:$0x11]  }
  0x4a   :  { %v1955_v0 = vsel %vm217_vm1, %v1950_v7, %v1954_v46  ;;  %v983_v38 = vrot.slane %v981_v17, 1  ;;  %v708_v46 = vld [vmem:[%s5589_s1 + $0x84] sm:$0xe]  ;;  %v709_v7 = vld [vmem:[%s5589_s1 + $0x90] sm:$0xe] }
  0x4b   :  { %1177 = vrot.lane.b32.xlu1 %v1139_v12, %s3903_s17  ;;  %v1143_v12 = vrot.slane %v3074_v44, 1 }
  0x4c   :  { %1049 = vrot.lane.b32.xlu0 %v948_v40, %s3904_s12  ;;  %v3158_v40 = vcombine.low %v1778_v58, %v4427_v25  ;;  %v4550_v25 = vld [vmem:[%s5590_s2 + $0x38] ss:$0 sps:$4 sm:$0x11]   ;;  %v4568_v58 = vcombine.low %v673_v36, %v674_v56  ;;  %v993_v36 = vshll.u32 %v3786_v4, 16 }
  0x4d   :  { %v1145_v44 = vsel %vm490_vm0, %v1143_v12, %v1144_v15  ;;  %v1976_v49 = vshll.u32 %v4550_v25, 16  ;;  %v4584_v12 = vld [vmem:[%s5589_s1 + $0xa0] sm:$0xf]  ;;  %v1969_v15 = vshrl.u32 %v4545_v26, 16 }
  0x4e   :  { %v2198_v37 = vrot.slane %v3158_v40, 1  ;;  %5605 = vst [vmem:[#allocation6_spill] sm:$0xff] %v4568_v58  ;;  %v988_v40 = vshll.u32 %v4568_v58, 16  ;;  %v4596_v20 = vcombine.low %v675_v8, %v4584_v12  ;;  %v1150_v8 = vrot.slane %v3786_v4, 1 }
  0x4f   :  { %2240 = vrot.lane.b32.xlu1 %v2194_v35, %s3903_s17  ;;  %v967_v35 = vor.u32 %v966_v60, %v962_v59  ;;  %v1961_v59 = vrot.slane %v1959_v27, 1  ;;  %v1964_v60 = vshll.u32 %v3780_v21, 16  ;;  %v1738_v21 = vld [vmem:[%s5590_s2 + $0x3c] sm:$0xf] }
  0x50   :  { %1051 = vrot.lane.b32.xlu0 %v960_v43, %s3904_s12  ;;  %v1957_v43 = vshrl.u32 %v4522_v62, 16  ;;  %v2200_v17 = vsel %vm490_vm0, %v2198_v37, %v2199_v51  ;;  %5606 = vst [vmem:[#allocation7_spill] sm:$0xff] %v4596_v20  ;;  %v1780_v51 = vld [vmem:[%s5590_s2 + $0x30] sm:$0xe] }
  0x51   :  { %v1966_v27 = vrot.slane %v1964_v60, 1  ;;  %v4610_v37 = vld [vmem:[%s5589_s1 + $0xa4] ss:$0 sps:$4 sm:$0x11]   ;;  %v3160_v60 = vcombine.low %v1780_v51, %v4533_v2 }
  0x52   :  { %v1962_v30 = vor.u32 %v1961_v59, %v1957_v43  ;;  %v1781_v43 = vld [vmem:[%s5590_s2 + $0x3c] sm:$0xe]  ;;  %v3794_v2 = vld [vmem:[%s5590_s2 + $0x44] ss:$0 sps:$4 sm:$0x11]  }
  0x53   :  { %2242 = vrot.lane.b32.xlu1 %v2197_v18, %s3903_s17  ;;  %v972_v18 = vsel %vm217_vm1, %v967_v35, %v971_v19  ;;  %v984_v19 = vsel %vm217_vm1, %v979_v48, %v983_v38  ;;  %v3076_v35 = vcombine.low %v709_v7, %v674_v56  ;;  %v2203_v38 = vsel %vm490_vm0, %v2201_v55, %v2202_v41  ;;  %v1740_v41 = vld [vmem:[%s5590_s2 + $0x48] sm:$0xf]  ;;  %v4630_v55 = vld [vmem:[%s5590_s2 + $0x4c] sm:$0xf] }
  0x54   :  { %2114 = vrot.lane.b32.xlu0 %v1943_v1, %s3904_s12  ;;  %v3075_v1 = vcombine.low %v708_v46, %v4480_v16  ;;  %v1973_v16 = vrot.slane %v1971_v54, 1  ;;  %v986_v56 = vshrl.u32 %v4568_v58, 16  ;;  %v990_v48 = vrot.slane %v988_v40, 1 }
  0x55   :  { %v1000_v54 = vshll.u32 %v4596_v20, 16  ;;  %v1967_v59 = vsel %vm217_vm1, %v1962_v30, %v1966_v27  ;;  %v3161_v7 = vcombine.low %v1781_v43, %v1739_v22  ;;  %v678_v30 = vld [vmem:[%s5589_s1 + $0xac] sm:$0xf]  ;;  %v2204_v27 = vrot.slane %v3160_v60, 1  ;;  %v710_v60 = vld [vmem:[%s5589_s1 + $0x9c] sm:$0xe] }
  0x56   :  { %v1974_v46 = vor.u32 %v1973_v16, %v1969_v15  ;;  %v995_v15 = vrot.slane %v993_v36, 1  ;;  %v991_v4 = vor.u32 %v990_v48, %v986_v56  ;;  %v2208_v36 = vrot.slane %v3794_v2, 1  ;;  %v4667_v48 = vld [vmem:[%s5589_s1 + $0xb0] ss:$0 sps:$4 sm:$0x11]  }
  0x57   :  { %2116 = vrot.lane.b32.xlu1 %v1955_v0, %s3904_s12  ;;  %v1978_v0 = vrot.slane %v1976_v49, 1  ;;  %v1149_v49 = vrot.slane %v3076_v35, 1  ;;  %v1988_v43 = vshll.u32 %v3794_v2, 16 }
  0x58   :  { %1179 = vrot.lane.b32.xlu0 %v1142_v31, %s3903_s17  ;;  %v1146_v31 = vrot.slane %v3075_v1, 1  ;;  %v1005_v1 = vshll.u32 %v4610_v37, 16 }
  0x59   :  { %v1979_v40 = vsel %vm217_vm1, %v1974_v46, %v1978_v0  ;;  %v2207_v0 = vrot.slane %v3161_v7, 1  ;;  %v1990_v7 = vrot.slane %v1988_v43, 1 }
  0x5a   :  { %v1007_v51 = vrot.slane %v1005_v1, 1 }
  0x5b   :  { %1181 = vrot.lane.b32.xlu1 %v1145_v44, %s3903_s17  ;;  %v4617_v44 = vcombine.low %v1738_v21, %v1739_v22  ;;  %v1148_v21 = vsel %vm490_vm0, %v1146_v31, %v1147_v61  ;;  %v677_v22 = vld [vmem:[%s5589_s1 + $0xa8] sm:$0xf]  ;;  %v4657_v61 = vld [vmem:[%s5590_s2 + $0x50] ss:$0 sps:$4 sm:$0x11]   ;;  %v1151_v31 = vsel %vm490_vm0, %v1149_v49, %v1150_v8 }
  0x5c   :  { %1053 = vrot.lane.b32.xlu0 %v972_v18, %s3904_s12  ;;  %v2205_v18 = vrot.slane %v4550_v25, 1  ;;  %v1002_v25 = vrot.slane %v1000_v54, 1  ;;  %v4662_v56 = vcombine.low %v677_v22, %v678_v30  ;;  %v996_v54 = vsel %vm217_vm1, %v991_v4, %v995_v15  ;;  %v4679_v49 = vld [vmem:[%s5589_s1 + $0xb8] sm:$0xf]  ;;  %v711_v15 = vld [vmem:[%s5589_s1 + $0xa8] sm:$0xe] }
  0x5d   :  { %5607 = vst [vmem:[#allocation8_spill] sm:$0xff] %v4617_v44  ;;  %v1983_v16 = vshll.u32 %v4617_v44, 16  ;;  %v1981_v35 = vshrl.u32 %v4617_v44, 16  ;;  %v2000_v8 = vshll.u32 %v4657_v61, 16  ;;  %v1742_v22 = vld [vmem:[%s5590_s2 + $0x54] sm:$0xf]  ;;  %v3078_v43 = vcombine.low %v711_v15, %v678_v30 }
  0x5e   :  { %5609 = vst [vmem:[#allocation10_spill] sm:$0xff] %v4662_v56  ;;  %v2206_v1 = vsel %vm490_vm0, %v2204_v27, %v2205_v18  ;;  %v3077_v18 = vcombine.low %v710_v60, %v4584_v12  ;;  %v4702_v27 = vld [vmem:[%s5590_s2 + $0x58] sm:$0xf]  ;;  %v2209_v12 = vsel %vm490_vm0, %v2207_v0, %v2208_v36  ;;  %v4725_v0 = vld [vmem:[%s5590_s2 + $0x64] sm:$0xf]  ;;  %v1156_v15 = vrot.slane %v4667_v48, 1 }
  0x5f   :  { %2244 = vrot.lane.b32.xlu1 %v2200_v17, %s3903_s17  ;;  %v998_v17 = vshrl.u32 %v4596_v20, 16 }
  0x60   :  { %1055 = vrot.lane.b32.xlu0 %v984_v19, %s3904_s12  ;;  %v4643_v19 = vcombine.low %v1740_v41, %v4630_v55  ;;  %v679_v41 = vld [vmem:[%s5589_s1 + $0xb4] sm:$0xf]  ;;  %v1152_v60 = vrot.slane %v3077_v18, 1  ;;  %v4752_v18 = vld [vmem:[%s5588_s0 + $0x64] sm:$0xf] }
  0x61   :  { %v4694_v4 = vcombine.low %v679_v41, %v4679_v49  ;;  %v1153_v41 = vrot.slane %v4610_v37, 1 }
  0x62   :  { %5608 = vst [vmem:[#allocation9_spill] sm:$0xff] %v4643_v19  ;;  %v1995_v46 = vshll.u32 %v4643_v19, 16  ;;  %v1993_v2 = vshrl.u32 %v4643_v19, 16 }
  0x63   :  { %2246 = vrot.lane.b32.xlu1 %v2203_v38, %s3903_s17  ;;  %v1985_v38 = vrot.slane %v1983_v16, 1  ;;  %5610 = vst [vmem:[#allocation11_spill] sm:$0xff] %v4694_v4 }
  0x64   :  { %2118 = vrot.lane.b32.xlu0 %v1967_v59, %s3904_s12  ;;  %v1003_v59 = vor.u32 %v1002_v25, %v998_v17  ;;  %v1997_v16 = vrot.slane %v1995_v46, 1  ;;  %v1017_v17 = vshll.u32 %v4667_v48, 16  ;;  %v1010_v46 = vshrl.u32 %v4662_v56, 16 }
  0x66   :  { %v1008_v25 = vsel %vm217_vm1, %v1003_v59, %v1007_v51  ;;  %v1782_v51 = vld [vmem:[%s5590_s2 + $0x48] sm:$0xe]  ;;  %v1744_v59 = vld [vmem:[%s5590_s2 + $0x60] sm:$0xf] }
  0x67   :  { %2120 = vrot.lane.b32.xlu1 %v1979_v40, %s3904_s12  ;;  %v1012_v40 = vshll.u32 %v4662_v56, 16 }
  0x68   :  { %1183 = vrot.lane.b32.xlu0 %v1148_v21, %s3903_s17  ;;  %v1986_v21 = vor.u32 %v1985_v38, %v1981_v35  ;;  %v2002_v35 = vrot.slane %v2000_v8, 1  ;;  %v4712_v38 = vld [vmem:[%s5589_s1 + $0xbc] ss:$0 sps:$4 sm:$0x11]   ;;  %v1155_v8 = vrot.slane %v3078_v43, 1 }
  0x69   :  { %v1014_v30 = vrot.slane %v1012_v40, 1  ;;  %v3162_v40 = vcombine.low %v1782_v51, %v4630_v55  ;;  %v41_v55 = vld [vmem:[%s5588_s0 + $0x60] sm:$0xf]  ;;  %v1783_v51 = vld [vmem:[%s5590_s2 + $0x54] sm:$0xe]  ;;  %v1159_v20 = vrot.slane %v4712_v38, 1 }
  0x6a   :  { %v1991_v36 = vsel %vm217_vm1, %v1986_v21, %v1990_v7  ;;  %v4740_v7 = vld [vmem:[%s5590_s2 + $0x5c] ss:$0 sps:$4 sm:$0x11]  }
  0x6b   :  { %1185 = vrot.lane.b32.xlu1 %v1151_v31, %s3903_s17  ;;  %v1998_v31 = vor.u32 %v1997_v16, %v1993_v2  ;;  %v1019_v2 = vrot.slane %v1017_v17, 1  ;;  %v4732_v16 = vcombine.low %v1744_v59, %v4725_v0  ;;  %v1015_v48 = vor.u32 %v1014_v30, %v1010_v46 }
  0x6c   :  { %1057 = vrot.lane.b32.xlu0 %v996_v54, %s3904_s12  ;;  %v4717_v54 = vcombine.low %v1742_v22, %v4702_v27  ;;  %v1029_v17 = vshll.u32 %v4712_v38, 16  ;;  %v1154_v22 = vsel %vm490_vm0, %v1152_v60, %v1153_v41  ;;  %v1157_v46 = vsel %vm490_vm0, %v1155_v8, %v1156_v15  ;;  %v43_v8 = vld [vmem:[%s5588_s0 + $0x6c] sm:$0xf]  ;;  %v4781_v15 = vld [vmem:[%s5588_s0 + $0x70] sm:$0xf] }
  0x6d   :  { %5612 = vst [vmem:[#allocation13_spill] sm:$0xff] %v4732_v16  ;;  %v2003_v37 = vsel %vm217_vm1, %v1998_v31, %v2002_v35  ;;  %v2211_v35 = vrot.slane %v4657_v61, 1  ;;  %v2019_v31 = vshll.u32 %v4732_v16, 16  ;;  %v2210_v30 = vrot.slane %v3162_v40, 1 }
  0x6e   :  { %5611 = vst [vmem:[#allocation12_spill] sm:$0xff] %v4717_v54  ;;  %v2007_v21 = vshll.u32 %v4717_v54, 16  ;;  %v2005_v59 = vshrl.u32 %v4717_v54, 16  ;;  %v1020_v41 = vsel %vm217_vm1, %v1015_v48, %v1019_v2  ;;  %v3163_v61 = vcombine.low %v1783_v51, %v4702_v27  ;;  %v712_v27 = vld [vmem:[%s5589_s1 + $0xb4] sm:$0xe] }
  0x6f   :  { %2248 = vrot.lane.b32.xlu1 %v2206_v1, %s3903_s17  ;;  %v1024_v1 = vshll.u32 %v4694_v4, 16  ;;  %v2021_v48 = vrot.slane %v2019_v31, 1  ;;  %v4803_v51 = vcombine.low %v43_v8, %v4781_v15  ;;  %v3079_v56 = vcombine.low %v712_v27, %v4679_v49 }
  0x70   :  { %1059 = vrot.lane.b32.xlu0 %v1008_v25, %s3904_s12  ;;  %v1022_v25 = vshrl.u32 %v4694_v4, 16  ;;  %v2012_v4 = vshll.u32 %v4740_v7, 16 }
  0x71   :  { %v1026_v43 = vrot.slane %v1024_v1, 1  ;;  %v2009_v1 = vrot.slane %v2007_v21, 1  ;;  %v4791_v21 = vld [vmem:[%s5588_s0 + $0x68] ss:$0 sps:$4 sm:$0x11]  }
  0x72   :  { %v322_v58 = vshll.u32 %v4791_v21, 16 }
  0x73   :  { %2250 = vrot.lane.b32.xlu1 %v2209_v12, %s3903_s17  ;;  %v4761_v12 = vld [vmem:[%s5590_s2 + $0x68] ss:$0 sps:$4 sm:$0x11]   ;;  %v1027_v40 = vor.u32 %v1026_v43, %v1022_v25  ;;  %v81_v25 = vld [vmem:[%s5588_s0 + $0x60] sm:$0xe] }
  0x74   :  { %2122 = vrot.lane.b32.xlu0 %v1991_v36, %s3904_s12  ;;  %v4769_v36 = vcombine.low %v41_v55, %v4752_v18  ;;  %v2017_v55 = vshrl.u32 %v4732_v16, 16  ;;  %v2024_v2 = vshll.u32 %v4761_v12, 16  ;;  %v1784_v43 = vld [vmem:[%s5590_s2 + $0x60] sm:$0xe]  ;;  %v2014_v16 = vrot.slane %v2012_v4, 1 }
  0x75   :  { %v3024_v8 = vcombine.low %v81_v25, %v4752_v18  ;;  %v4819_v4 = vld [vmem:[%s5590_s2 + $0x70] sm:$0xf] }
  0x76   :  { %v2026_v19 = vrot.slane %v2024_v2, 1  ;;  %v2022_v26 = vor.u32 %v2021_v48, %v2017_v55  ;;  %v315_v38 = vshrl.u32 %v4769_v36, 16  ;;  %v1158_v55 = vrot.slane %v3079_v56, 1 }
  0x77   :  { %2124 = vrot.lane.b32.xlu1 %v2003_v37, %s3904_s12  ;;  %v1031_v37 = vrot.slane %v1029_v17, 1  ;;  %v317_v17 = vshll.u32 %v4769_v36, 16  ;;  %v515_v48 = vrot.slane %v3024_v8, 1 }
  0x78   :  { %1187 = vrot.lane.b32.xlu0 %v1154_v22, %s3903_s17  ;;  %v2212_v22 = vsel %vm490_vm0, %v2210_v30, %v2211_v35  ;;  %v2214_v35 = vrot.slane %v4740_v7, 1  ;;  %v2010_v30 = vor.u32 %v2009_v1, %v2005_v59  ;;  %v1746_v7 = vld [vmem:[%s5590_s2 + $0x6c] sm:$0xf]  ;;  %v329_v59 = vshll.u32 %v4803_v51, 16 }
  0x79   :  { %v540_v60 = vpop.permute.xlu1 %539  ;;  %v1032_v54 = vsel %vm217_vm1, %v1027_v40, %v1031_v37  ;;  %v319_v18 = vrot.slane %v317_v17, 1  ;;  %v4841_v40 = vld [vmem:[%s5590_s2 + $0x7c] sm:$0xf]  ;;  %v4847_v2 = vcombine.low %v1746_v7, %v4819_v4  ;;  %v2027_v27 = vsel %vm217_vm1, %v2022_v26, %v2026_v19  ;;  %v1785_v17 = vld [vmem:[%s5590_s2 + $0x6c] sm:$0xe] }
  0x7a   :  { %v331_v19 = vrot.slane %v329_v59, 1  ;;  %v1160_v8 = vsel %vm490_vm0, %v1158_v55, %v1159_v20  ;;  %v4875_v7 = vld [vmem:[%s5590_s2 + $0x80] ss:$0 sps:$4 sm:$0x11]   ;;  %v45_v20 = vld [vmem:[%s5588_s0 + $0x78] sm:$0xf] }
  0x7b   :  { %1189 = vrot.lane.b32.xlu1 %v1157_v46, %s3903_s17  ;;  %v2213_v46 = vrot.slane %v3163_v61, 1  ;;  %v46_v59 = vld [vmem:[%s5588_s0 + $0x7c] sm:$0xf] }
  0x7c   :  { %1061 = vrot.lane.b32.xlu0 %v1020_v41, %s3904_s12  ;;  %v3164_v41 = vcombine.low %v1784_v43, %v4725_v0  ;;  %v4828_v0 = vld [vmem:[%s5588_s0 + $0x74] ss:$0 sps:$4 sm:$0x11]   ;;  %v327_v43 = vshrl.u32 %v4803_v51, 16 }
  0x7d   :  { %v1162_v31 = vpop.permute.xlu1 %1161  ;;  %v2215_v1 = vsel %vm490_vm0, %v2213_v46, %v2214_v35  ;;  %v4860_v46 = vld [vmem:[%s5590_s2 + $0x74] ss:$0 sps:$4 sm:$0x11]   ;;  %v519_v35 = vrot.slane %v4828_v0, 1 }
  0x7e   :  { %v411_v44 = vpop.permute.xlu0 %410  ;;  %v2216_v25 = vrot.slane %v3164_v41, 1  ;;  %v2031_v41 = vshll.u32 %v4847_v2, 16 }
  0x7f   :  { %v573_v49 = vsel %vm571_vm2, %v3960_v9, %v411_v44  ;;  %2252 = vrot.lane.b32.xlu1 %v2212_v22, %s3903_s17  ;;  %v2015_v9 = vsel %vm217_vm1, %v2010_v30, %v2014_v16  ;;  %v1748_v44 = vld [vmem:[%s5590_s2 + $0x78] sm:$0xf]  ;;  %v324_v22 = vrot.slane %v322_v58, 1 }
  0x80   :  { %1063 = vrot.lane.b32.xlu0 %v1032_v54, %s3904_s12  ;;  %v606_v61 = vsel %vm604_vm3, %v573_v49, %v540_v60  ;;  %v516_v54 = vrot.slane %v4791_v21, 1  ;;  %v2217_v60 = vrot.slane %v4761_v12, 1  ;;  %v320_v21 = vor.u32 %v319_v18, %v315_v38 }
  0x81   :  { %3555 = vmatprep.mubr.msk.bf16.mxu0 %vm1305_vm4, %v606_v61  ;;  %v413_v37 = vpop.permute.xlu1 %412  ;;  %v4863_v26 = vcombine.low %v1748_v44, %v4841_v40  ;;  %v3165_v18 = vcombine.low %v1785_v17, %v4819_v4  ;;  %v83_v4 = vld [vmem:[%s5588_s0 + $0x78] sm:$0xe] }
  0x82   :  { %v1034_v16 = vpop.permute.xlu0 %1033  ;;  %v517_v38 = vsel %vm490_vm0, %v515_v48, %v516_v54  ;;  %v332_v54 = vor.u32 %v331_v19, %v327_v43  ;;  %v2029_v48 = vshrl.u32 %v4847_v2, 16  ;;  %v575_v43 = vsel %vm571_vm2, %v3983_v23, %v413_v37 }
  0x83   :  { %v1194_v56 = vsel %vm571_vm2, %v3965_v11, %v1034_v16  ;;  %2254 = vrot.lane.b32.xlu1 %v2215_v1, %s3903_s17  ;;  %v334_v11 = vshll.u32 %v4828_v0, 16  ;;  %v325_v1 = vsel %vm217_vm1, %v320_v21, %v324_v22  ;;  %v2043_v44 = vshll.u32 %v4863_v26, 16  ;;  %v3855_v21 = vld [vmem:[%s5591_s3 + $0x68] sm:$0xff]   ;;  %v5039_v0 = vld [vmem:[%s5588_s0 + $0x94] sm:$0xf] }
  0x84   :  { %2126 = vrot.lane.b32.xlu0 %v2015_v9, %s3904_s12  ;;  %v1226_v58 = vsel %vm604_vm3, %v1194_v56, %v1162_v31  ;;  %v82_v31 = vld [vmem:[%s5588_s0 + $0x6c] sm:$0xe]  ;;  %v2036_v9 = vshll.u32 %v4860_v46, 16  ;;  %v2033_v22 = vrot.slane %v2031_v41, 1  ;;  %v4903_v56 = vcombine.low %v45_v20, %v46_v59 }
  0x85   :  { %3511 = vmatprep.mubr.msk.bf16.mxu1 %vm1305_vm4, %v1226_v58  ;;  %v1164_v30 = vpop.permute.xlu1 %1163  ;;  %v336_v16 = vrot.slane %v334_v11, 1  ;;  %v3025_v17 = vcombine.low %v82_v31, %v4781_v15  ;;  %v2219_v19 = vrot.slane %v3165_v18, 1  ;;  %v3026_v11 = vcombine.low %v83_v4, %v46_v59  ;;  %v4917_v15 = vld [vmem:[%s5588_s0 + $0x88] sm:$0xf]  ;;  %v1750_v59 = vld [vmem:[%s5590_s2 + $0x84] sm:$0xf] }
  0x86   :  { %v1036_v49 = vpop.permute.xlu0 %1035  ;;  %v2038_v37 = vrot.slane %v2036_v9, 1  ;;  %v2041_v41 = vshrl.u32 %v4863_v26, 16  ;;  %v2045_v31 = vrot.slane %v2043_v44, 1  ;;  %v3874_v18 = vld [vmem:[%s5591_s3 + $0x8] sm:$0xff]   ;;  %v2034_v44 = vor.u32 %v2033_v22, %v2029_v48 }
  0x87   :  { %v1196_v61 = vsel %vm571_vm2, %v4014_v42, %v1036_v49  ;;  %2128 = vrot.lane.b32.xlu1 %v2027_v27, %s3904_s12  ;;  %v2220_v42 = vrot.slane %v4860_v46, 1  ;;  %v2048_v46 = vshll.u32 %v4875_v7, 16  ;;  %v4928_v49 = vld [vmem:[%s5588_s0 + $0x80] ss:$0 sps:$4 sm:$0x11]   ;;  %v337_v20 = vsel %vm217_vm1, %v332_v54, %v336_v16 }
  0x88   :  { %1191 = vrot.lane.b32.xlu0 %v1160_v8, %s3903_s17  ;;  %v1228_v55 = vsel %vm604_vm3, %v1196_v61, %v1164_v30  ;;  %v47_v30 = vld [vmem:[%s5588_s0 + $0x84] sm:$0xf]  ;;  %v4945_v61 = vld [vmem:[%s5590_s2 + $0x88] sm:$0xf]  ;;  %v341_v4 = vshll.u32 %v4903_v56, 16  ;;  %v521_v54 = vrot.slane %v3026_v11, 1 }
  0x89   :  { %3512 = vmatmul.mubr.msk.bf16.vlgmr.msra.gmra.mrb[0].mxu1 %vm1305_vm4, %v1228_v55  ;;  %v1038_v27 = vpop.permute.xlu1 %1037  ;;  %v3873_v8 = vld [vmem:[%s5591_s3] sm:$0xff]   ;;  %v4949_v12 = vcombine.low %v47_v30, %v4917_v15  ;;  %v2050_v55 = vrot.slane %v2048_v46, 1  ;;  %v2223_v16 = vrot.slane %v4875_v7, 1  ;;  %v4959_v48 = vld [vmem:[%s5588_s0 + $0x8c] ss:$0 sps:$4 sm:$0x11]   ;;  %v2221_v11 = vsel %vm490_vm0, %v2219_v19, %v2220_v42 }
  0x8a   :  { %v542_v58 = vpop.permute.xlu0 %541  ;;  %3637 = vmatpush3.bf16.msra.mxu1 %v3873_v8  ;;  %v3875_v46 = vld [vmem:[%s5591_s3 + $0x10] sm:$0xff]   ;;  %v2046_v30 = vor.u32 %v2045_v31, %v2041_v41  ;;  %v1787_v8 = vld [vmem:[%s5590_s2 + $0x84] sm:$0xe]  ;;  %v522_v41 = vrot.slane %v4928_v49, 1  ;;  %v358_v31 = vshll.u32 %v4959_v48, 16 }
  0x8b   :  { %v608_v23 = vsel %vm604_vm3, %v575_v43, %v542_v58  ;;  %555 = vrot.lane.b32.xlu1 %v517_v38, %s3903_s17  ;;  %3632 = vmatprep.subr.bf16.mxu1 %v3874_v18  ;;  %v2218_v38 = vsel %vm490_vm0, %v2216_v25, %v2217_v60  ;;  %v3859_v60 = vld [vmem:[%s5591_s3 + $0x70] sm:$0xff]   ;;  %v1786_v43 = vld [vmem:[%s5590_s2 + $0x78] sm:$0xe]  ;;  %v4970_v58 = vcombine.low %v1750_v59, %v4945_v61  ;;  %v343_v59 = vrot.slane %v341_v4, 1  ;;  %v1754_v7 = vld [vmem:[%s5590_s2 + $0x9c] sm:$0xf] }
  0x8c   :  { %426 = vrot.lane.b32.xlu0 %v325_v1, %s3904_s12  ;;  %3556 = vmatmul.mubr.msk.bf16.vlgmr.msra.gmra.mrb[0].mxu0 %vm1305_vm4, %v608_v23  ;;  %v518_v1 = vrot.slane %v3025_v17, 1  ;;  %v346_v17 = vshll.u32 %v4928_v49, 16  ;;  %v1198_v23 = vsel %vm571_vm2, %v4031_v53, %v1038_v27  ;;  %v1752_v42 = vld [vmem:[%s5590_s2 + $0x90] sm:$0xf]  ;;  %v4992_v19 = vld [vmem:[%s5590_s2 + $0x94] sm:$0xf]  ;;  %v3167_v4 = vcombine.low %v1787_v8, %v4945_v61 }
  0x8d   :  { %v544_v9 = vpop.permute.xlu1 %543  ;;  %3588 = vmatpush3.bf16.msra.mxu0 %v4349_v29  ;;  %v339_v29 = vshrl.u32 %v4903_v56, 16  ;;  %v2055_v49 = vshll.u32 %v4970_v58, 16  ;;  %v523_v8 = vsel %vm490_vm0, %v521_v54, %v522_v41  ;;  %v3871_v41 = vld [vmem:[%s5591_s3 + $0x88] sm:$0xff]  }
  0x8e   :  { %v415_v25 = vpop.permute.xlu0 %414  ;;  %3589 = vmatprep.subr.bf16.mxu0 %v3855_v21  ;;  %3638 = vmatpush3.bf16.msra.mxu1 %v3874_v18  ;;  %v520_v61 = vsel %vm490_vm0, %v518_v1, %v519_v35  ;;  %v2053_v1 = vshrl.u32 %v4970_v58, 16 }
  0x8f   :  { %v577_v22 = vsel %vm571_vm2, %v4063_v13, %v415_v25  ;;  %2256 = vrot.lane.b32.xlu1 %v2218_v38, %s3903_s17  ;;  %3633 = vmatprep.subr.bf16.mxu1 %v3875_v46  ;;  %v2039_v38 = vsel %vm217_vm1, %v2034_v44, %v2038_v37  ;;  %v3166_v37 = vcombine.low %v1786_v43, %v4841_v40  ;;  %v348_v44 = vrot.slane %v346_v17, 1  ;;  %v5023_v43 = vld [vmem:[%s5591_s3 + $0x80] sm:$0xff]  }
  0x90   :  { %428 = vrot.lane.b32.xlu0 %v337_v20, %s3904_s12  ;;  %v610_v13 = vsel %vm604_vm3, %v577_v22, %v544_v9  ;;  %v353_v20 = vshll.u32 %v4949_v12, 16  ;;  %v3863_v9 = vld [vmem:[%s5591_s3 + $0x78] sm:$0xff]   ;;  %v2051_v40 = vsel %vm217_vm1, %v2046_v30, %v2050_v55  ;;  %v5013_v25 = vcombine.low %v1752_v42, %v4992_v19 }
  0x91   :  { %3559 = vmatprep.mubr.msk.bf16.mxu0 %vm1305_vm4, %v610_v13  ;;  %v1166_v18 = vpop.permute.xlu1 %1165  ;;  %3590 = vmatpush3.bf16.msra.mxu0 %v3855_v21  ;;  %v5006_v21 = vld [vmem:[%s5590_s2 + $0x8c] ss:$0 sps:$4 sm:$0x11]   ;;  %v5018_v22 = vld [vmem:[%s5590_s2 + $0x98] ss:$0 sps:$4 sm:$0x11]  }
  0x92   :  { %v1230_v53 = vsel %vm604_vm3, %v1198_v23, %v1166_v18  ;;  %v417_v27 = vpop.permute.xlu0 %416  ;;  %3591 = vmatprep.subr.bf16.mxu0 %v3859_v60  ;;  %3639 = vmatpush3.bf16.msra.mxu1 %v3875_v46  ;;  %v3876_v55 = vld [vmem:[%s5591_s3 + $0x18] sm:$0xff]   ;;  %v344_v46 = vor.u32 %v343_v59, %v339_v29  ;;  %v351_v13 = vshrl.u32 %v4949_v12, 16  ;;  %v2222_v23 = vrot.slane %v3166_v37, 1  ;;  %v3877_v29 = vld [vmem:[%s5591_s3 + $0x20] sm:$0xff]  }
  0x93   :  { %2258 = vrot.lane.b32.xlu1 %v2221_v11, %s3903_s17  ;;  %3515 = vmatprep.mubr.msk.bf16.mxu1 %vm1305_vm4, %v1230_v53  ;;  %v355_v11 = vrot.slane %v353_v20, 1  ;;  %v360_v18 = vrot.slane %v358_v31, 1  ;;  %v2060_v54 = vshll.u32 %v5006_v21, 16  ;;  %v2225_v20 = vrot.slane %v3167_v4, 1  ;;  %v84_v53 = vld [vmem:[%s5588_s0 + $0x84] sm:$0xe] }
  0x94   :  { %2130 = vrot.lane.b32.xlu0 %v2039_v38, %s3904_s12  ;;  %3634 = vmatprep.subr.bf16.mxu1 %v3876_v55  ;;  %v49_v38 = vld [vmem:[%s5588_s0 + $0x90] sm:$0xf]  ;;  %v2226_v42 = vrot.slane %v5006_v21, 1  ;;  %v349_v31 = vsel %vm217_vm1, %v344_v46, %v348_v44  ;;  %v5068_v4 = vld [vmem:[%s5588_s0 + $0x98] ss:$0 sps:$4 sm:$0x11]  }
  0x95   :  { %v1168_v17 = vpop.permute.xlu1 %1167  ;;  %3592 = vmatpush3.bf16.msra.mxu0 %v3859_v60  ;;  %v2057_v60 = vrot.slane %v2055_v49, 1  ;;  %v356_v49 = vor.u32 %v355_v11, %v351_v13  ;;  %v5063_v21 = vcombine.low %v49_v38, %v5039_v0  ;;  %v2062_v11 = vrot.slane %v2060_v54, 1 }
  0x96   :  { %v1040_v30 = vpop.permute.xlu0 %1039  ;;  %3593 = vmatprep.subr.bf16.mxu0 %v3863_v9  ;;  %3640 = vmatpush3.bf16.msra.mxu1 %v3876_v55  ;;  %v51_v55 = vld [vmem:[%s5588_s0 + $0x9c] sm:$0xf] }
  0x97   :  { %v1200_v35 = vsel %vm571_vm2, %v4113_v47, %v1040_v30  ;;  %2132 = vrot.lane.b32.xlu1 %v2051_v40, %s3904_s12  ;;  %3635 = vmatprep.subr.bf16.mxu1 %v3877_v29  ;;  %v2067_v47 = vshll.u32 %v5013_v25, 16  ;;  %v2072_v40 = vshll.u32 %v5018_v22, 16  ;;  %v2058_v13 = vor.u32 %v2057_v60, %v2053_v1 }
  0x98   :  { %557 = vrot.lane.b32.xlu0 %v520_v61, %s3903_s17  ;;  %v1232_v59 = vsel %vm604_vm3, %v1200_v35, %v1168_v17  ;;  %v579_v17 = vsel %vm571_vm2, %v4098_v39, %v417_v27  ;;  %v5078_v61 = vld [vmem:[%s5588_s0 + $0xa0] sm:$0xf]  ;;  %v3027_v30 = vcombine.low %v84_v53, %v4917_v15  ;;  %v85_v39 = vld [vmem:[%s5588_s0 + $0x90] sm:$0xe]  ;;  %v2224_v27 = vsel %vm490_vm0, %v2222_v23, %v2223_v16 }
  0x99   :  { %3516 = vmatmul.mubr.msk.bf16.gmra.mrb[4].mxu1 %vm1305_vm4, %v1232_v59  ;;  %v1042_v37 = vpop.permute.xlu1 %1041  ;;  %3594 = vmatpush3.bf16.msra.mxu0 %v3863_v9  ;;  %v2065_v9 = vshrl.u32 %v5013_v25, 16  ;;  %v1788_v15 = vld [vmem:[%s5590_s2 + $0x90] sm:$0xe]  ;;  %v361_v35 = vsel %vm217_vm1, %v356_v49, %v360_v18  ;;  %v525_v1 = vrot.slane %v4959_v48, 1  ;;  %v365_v60 = vshll.u32 %v5063_v21, 16  ;;  %v3878_v48 = vld [vmem:[%s5591_s3 + $0x28] sm:$0xff]  }
  0x9a   :  { %v546_v44 = vpop.permute.xlu0 %545  ;;  %3595 = vmatprep.subr.bf16.mxu0 %v5023_v43  ;;  %3641 = vmatpush3.bf16.msra.mxu1 %v3877_v29  ;;  %v5100_v54 = vcombine.low %v51_v55, %v5078_v61  ;;  %v5108_v16 = vld [vmem:[%s5590_s2 + $0xa0] sm:$0xf]  ;;  %v2227_v18 = vsel %vm490_vm0, %v2225_v20, %v2226_v42  ;;  %v2074_v29 = vrot.slane %v2072_v40, 1  ;;  %v3028_v59 = vcombine.low %v85_v39, %v5039_v0  ;;  %v5125_v20 = vld [vmem:[%s5588_s0 + $0xa4] ss:$0 sps:$4 sm:$0x11]  }
  0x9b   :  { %v612_v46 = vsel %vm604_vm3, %v579_v17, %v546_v44  ;;  %559 = vrot.lane.b32.xlu1 %v523_v8, %s3903_s17  ;;  %v2069_v8 = vrot.slane %v2067_v47, 1  ;;  %3636 = vmatprep.subr.bf16.mxu1 %v3878_v48  ;;  %v370_v47 = vshll.u32 %v5068_v4, 16  ;;  %v528_v49 = vrot.slane %v5068_v4, 1 }
  0x9c   :  { %430 = vrot.lane.b32.xlu0 %v349_v31, %s3904_s12  ;;  %3560 = vmatmul.mubr.msk.bf16.gmra.mrb[4].mxu0 %vm1305_vm4, %v612_v46  ;;  %v524_v31 = vrot.slane %v3027_v30, 1  ;;  %v5131_v40 = vcombine.low %v1754_v7, %v5108_v16  ;;  %v1202_v55 = vsel %vm571_vm2, %v4142_v3, %v1042_v37  ;;  %v367_v17 = vrot.slane %v365_v60, 1 }
  0x9d   :  { %v548_v38 = vpop.permute.xlu1 %547  ;;  %3596 = vmatpush3.bf16.msra.mxu0 %v5023_v43  ;;  %v2063_v43 = vsel %vm217_vm1, %v2058_v13, %v2062_v11  ;;  %v2070_v42 = vor.u32 %v2069_v8, %v2065_v9  ;;  %v3168_v44 = vcombine.low %v1788_v15, %v4992_v19  ;;  %v377_v46 = vshll.u32 %v5100_v54, 16  ;;  %v1756_v13 = vld [vmem:[%s5590_s2 + $0xa8] sm:$0xf]  ;;  %v5144_v11 = vld [vmem:[%s5590_s2 + $0xac] sm:$0xf] }
  0x9e   :  { %v419_v23 = vpop.permute.xlu0 %418  ;;  %3597 = vmatprep.subr.bf16.mxu0 %v3871_v41  ;;  %3642 = vmatpush3.bf16.msra.mxu1 %v3878_v48  ;;  %v527_v30 = vrot.slane %v3028_v59, 1  ;;  %v372_v39 = vrot.slane %v370_v47, 1  ;;  %v526_v19 = vsel %vm490_vm0, %v524_v31, %v525_v1  ;;  %v1789_v9 = vld [vmem:[%s5590_s2 + $0x9c] sm:$0xe]  ;;  %v2229_v15 = vrot.slane %v5018_v22, 1 }
  0x9f   :  { %v581_v53 = vsel %vm571_vm2, %v4172_v24, %v419_v23  ;;  %2260 = vrot.lane.b32.xlu1 %v2224_v27, %s3903_s17  ;;  %v363_v24 = vshrl.u32 %v5063_v21, 16  ;;  %v382_v27 = vshll.u32 %v5125_v20, 16  ;;  %v2075_v8 = vsel %vm217_vm1, %v2070_v42, %v2074_v29  ;;  %v53_v22 = vld [vmem:[%s5588_s0 + $0xa8] sm:$0xf]  ;;  %v5177_v47 = vld [vmem:[%s5588_s0 + $0xac] sm:$0xf] }
  0xa0   :  { %432 = vrot.lane.b32.xlu0 %v361_v35, %s3904_s12  ;;  %v614_v0 = vsel %vm604_vm3, %v581_v53, %v548_v38  ;;  %v2079_v38 = vshll.u32 %v5131_v40, 16  ;;  %v5162_v35 = vcombine.low %v1756_v13, %v5144_v11  ;;  %v2228_v7 = vrot.slane %v3168_v44, 1 }
  0xa1   :  { %3563 = vmatprep.mubr.msk.bf16.mxu0 %vm1305_vm4, %v614_v0  ;;  %v1170_v4 = vpop.permute.xlu1 %1169  ;;  %3598 = vmatpush3.bf16.msra.mxu0 %v3871_v41  ;;  %v3853_v41 = vld [vmem:[%s5590_s2 + $0xa4] ss:$0 sps:$4 sm:$0x11]   ;;  %v368_v60 = vor.u32 %v367_v17, %v363_v24  ;;  %v375_v48 = vshrl.u32 %v5100_v54, 16  ;;  %v379_v23 = vrot.slane %v377_v46, 1  ;;  %v3169_v29 = vcombine.low %v1789_v9, %v5108_v16 }
  0xa2   :  { %v1234_v3 = vsel %vm604_vm3, %v1202_v55, %v1170_v4  ;;  %v421_v37 = vpop.permute.xlu0 %420  ;;  %v2077_v31 = vshrl.u32 %v5131_v40, 16  ;;  %v2084_v0 = vshll.u32 %v3853_v41, 16  ;;  %v529_v42 = vsel %vm490_vm0, %v527_v30, %v528_v49  ;;  %v86_v4 = vld [vmem:[%s5588_s0 + $0x9c] sm:$0xe] }
  0xa3   :  { %2262 = vrot.lane.b32.xlu1 %v2227_v18, %s3903_s17  ;;  %3519 = vmatprep.mubr.msk.bf16.mxu1 %vm1305_vm4, %v1234_v3  ;;  %v5168_v18 = vld [vmem:[%s5590_s2 + $0xb0] ss:$0 sps:$4 sm:$0x11]   ;;  %v2081_v24 = vrot.slane %v2079_v38, 1  ;;  %v2091_v55 = vshll.u32 %v5162_v35, 16 }
  0xa4   :  { %2134 = vrot.lane.b32.xlu0 %v2063_v43, %s3904_s12  ;;  %v384_v43 = vrot.slane %v382_v27, 1 }
  0xa5   :  { %v1172_v1 = vpop.permute.xlu1 %1171 }
  0xa6   :  { %v1044_v59 = vpop.permute.xlu0 %1043 }
  0xa7   :  { %v1204_v53 = vsel %vm571_vm2, %v4228_v63, %v1044_v59  ;;  %2136 = vrot.lane.b32.xlu1 %v2075_v8, %s3904_s12 }
  0xa8   :  { %561 = vrot.lane.b32.xlu0 %v526_v19, %s3903_s17  ;;  %v1236_v16 = vsel %vm604_vm3, %v1204_v53, %v1172_v1 }
  0xa9   :  { %11 = vsyncpa [#allocation3], 0  ;;  %3520 = vmatmul.mubr.msk.bf16.gmra.mrb[8].mxu1 %vm1305_vm4, %v1236_v16  ;;  %v1046_v63 = vpop.permute.xlu1 %1045  ;;  %v373_v17 = vsel %vm217_vm1, %v368_v60, %v372_v39  ;;  %v380_v44 = vor.u32 %v379_v23, %v375_v48  ;;  %v2232_v46 = vrot.slane %v3853_v41, 1  ;;  %v5193_v13 = vcombine.low %v53_v22, %v5177_v47  ;;  %v55_v27 = vld [vmem:[%s5588_s0 + $0xb4] sm:$0xf] }
  0xaa   :  { %v583_v49 = vsel %vm571_vm2, %v4206_v52, %v421_v37  ;;  %v550_v3 = vpop.permute.xlu0 %549  ;;  %v2231_v30 = vrot.slane %v3169_v29, 1  ;;  %v2096_v19 = vshll.u32 %v5168_v18, 16  ;;  %v5204_v39 = vld [vmem:[%s5588_s0 + $0xb8] sm:$0xf]  ;;  %v2086_v41 = vrot.slane %v2084_v0, 1 }
  0xab   :  { %v616_v9 = vsel %vm604_vm3, %v583_v49, %v550_v3  ;;  %563 = vrot.lane.b32.xlu1 %v529_v42, %s3903_s17  ;;  %v2089_v52 = vshrl.u32 %v5162_v35, 16  ;;  %v3029_v37 = vcombine.low %v86_v4, %v5078_v61  ;;  %v2230_v8 = vsel %vm490_vm0, %v2228_v7, %v2229_v15  ;;  %v87_v60 = vld [vmem:[%s5588_s0 + $0xa8] sm:$0xe]  ;;  %v3861_v48 = vld [vmem:[%s5588_s0 + $0xb0] ss:$0 sps:$4 sm:$0x11]  }
  0xac   :  { %434 = vrot.lane.b32.xlu0 %v373_v17, %s3904_s12  ;;  %3564 = vmatmul.mubr.msk.bf16.gmra.mrb[8].mxu0 %vm1305_vm4, %v616_v9  ;;  %v2082_v38 = vor.u32 %v2081_v24, %v2077_v31  ;;  %v2093_v1 = vrot.slane %v2091_v55, 1  ;;  %v385_v59 = vsel %vm217_vm1, %v380_v44, %v384_v43  ;;  %v389_v61 = vshll.u32 %v5193_v13, 16  ;;  %v1758_v31 = vld [vmem:[%s5590_s2 + $0xb4] sm:$0xf]  ;;  %v5232_v0 = vld [vmem:[%s5590_s2 + $0xb8] sm:$0xf] }
  0xad   :  { %v552_v23 = vpop.permute.xlu1 %551  ;;  %v5222_v29 = vcombine.low %v55_v27, %v5204_v39  ;;  %v2233_v15 = vsel %vm490_vm0, %v2231_v30, %v2232_v46  ;;  %v2098_v7 = vrot.slane %v2096_v19, 1  ;;  %v531_v53 = vrot.slane %v5125_v20, 1  ;;  %v1790_v44 = vld [vmem:[%s5590_s2 + $0xa8] sm:$0xe] }
  0xae   :  { %v423_v22 = vpop.permute.xlu0 %422  ;;  %v530_v16 = vrot.slane %v3029_v37, 1  ;;  %v3030_v42 = vcombine.low %v87_v60, %v5177_v47  ;;  %v387_v24 = vshrl.u32 %v5193_v13, 16  ;;  %v2087_v55 = vsel %vm217_vm1, %v2082_v38, %v2086_v41  ;;  %v3869_v38 = vld [vmem:[%s5590_s2 + $0xbc] ss:$0 sps:$4 sm:$0x11]  }
  0xaf   :  { %v585_v43 = vsel %vm571_vm2, %v4275_v32, %v423_v22  ;;  %2264 = vrot.lane.b32.xlu1 %v2230_v8, %s3903_s17  ;;  %v2094_v4 = vor.u32 %v2093_v1, %v2089_v52  ;;  %v394_v17 = vshll.u32 %v3861_v48, 16  ;;  %v5248_v32 = vld [vmem:[%s5588_s0 + $0xbc] ss:$0 sps:$4 sm:$0x11]   ;;  %v1206_v47 = vsel %vm571_vm2, %v4247_v10, %v1046_v63 }
  0xb0   :  { %436 = vrot.lane.b32.xlu0 %v385_v59, %s3904_s12  ;;  %v618_v20 = vsel %vm604_vm3, %v585_v43, %v552_v23  ;;  %v391_v49 = vrot.slane %v389_v61, 1  ;;  %v401_v3 = vshll.u32 %v5222_v29, 16  ;;  %v5255_v30 = vcombine.low %v1758_v31, %v5232_v0  ;;  %v1791_v59 = vld [vmem:[%s5590_s2 + $0xb4] sm:$0xe] }
  0xb1   :  { %3567 = vmatprep.mubr.msk.bf16.mxu0 %vm1305_vm4, %v618_v20  ;;  %v1174_v46 = vpop.permute.xlu1 %1173  ;;  %v533_v9 = vrot.slane %v3030_v42, 1  ;;  %v534_v41 = vrot.slane %v3861_v48, 1  ;;  %v3170_v10 = vcombine.low %v1790_v44, %v5144_v11  ;;  %v2099_v63 = vsel %vm217_vm1, %v2094_v4, %v2098_v7  ;;  %v88_v44 = vld [vmem:[%s5588_s0 + $0xb4] sm:$0xe] }
  0xb2   :  { %v1238_v19 = vsel %vm604_vm3, %v1206_v47, %v1174_v46  ;;  %v425_v27 = vpop.permute.xlu0 %424  ;;  %v532_v52 = vsel %vm490_vm0, %v530_v16, %v531_v53  ;;  %v396_v37 = vrot.slane %v394_v17, 1  ;;  %v406_v8 = vshll.u32 %v5248_v32, 16 }
  0xb3   :  { %2266 = vrot.lane.b32.xlu1 %v2233_v15, %s3903_s17  ;;  %3523 = vmatprep.mubr.msk.bf16.mxu1 %vm1305_vm4, %v1238_v19  ;;  %v392_v60 = vor.u32 %v391_v49, %v387_v24  ;;  %v399_v23 = vshrl.u32 %v5222_v29, 16  ;;  %v403_v48 = vrot.slane %v401_v3, 1  ;;  %v2103_v11 = vshll.u32 %v5255_v30, 16 }
  0xb4   :  { %2138 = vrot.lane.b32.xlu0 %v2087_v55, %s3904_s12  ;;  %v535_v15 = vsel %vm490_vm0, %v533_v9, %v534_v41  ;;  %v2234_v7 = vrot.slane %v3170_v10, 1  ;;  %v2235_v53 = vrot.slane %v5168_v18, 1  ;;  %v408_v43 = vrot.slane %v406_v8, 1 }
  0xb5   :  { %v1176_v1 = vpop.permute.xlu1 %1175  ;;  %v2101_v16 = vshrl.u32 %v5255_v30, 16  ;;  %v3171_v42 = vcombine.low %v1791_v59, %v5232_v0  ;;  %v404_v20 = vor.u32 %v403_v48, %v399_v23  ;;  %v2105_v55 = vrot.slane %v2103_v11, 1 }
  0xb6   :  { %v1048_v61 = vpop.permute.xlu0 %1047  ;;  %v2108_v4 = vshll.u32 %v3869_v38, 16  ;;  %v587_v18 = vsel %vm571_vm2, %v4303_v57, %v425_v27  ;;  %v2236_v0 = vsel %vm490_vm0, %v2234_v7, %v2235_v53  ;;  %v2238_v49 = vrot.slane %v3869_v38, 1 }
  0xb7   :  { %v1208_v22 = vsel %vm571_vm2, %v4319_v6, %v1048_v61  ;;  %2140 = vrot.lane.b32.xlu1 %v2099_v63, %s3904_s12  ;;  %v397_v6 = vsel %vm217_vm1, %v392_v60, %v396_v37  ;;  %v2237_v46 = vrot.slane %v3171_v42, 1  ;;  %v409_v57 = vsel %vm217_vm1, %v404_v20, %v408_v43 }
  0xb8   :  { %565 = vrot.lane.b32.xlu0 %v532_v52, %s3903_s17  ;;  %v1240_v31 = vsel %vm604_vm3, %v1208_v22, %v1176_v1  ;;  %v2106_v19 = vor.u32 %v2105_v55, %v2101_v16  ;;  %v2110_v27 = vrot.slane %v2108_v4, 1  ;;  %v3031_v9 = vcombine.low %v88_v44, %v5204_v39 }
  0xb9   :  { %3524 = vmatmul.mubr.msk.bf16.gmra.mrb[12].mxu1 %vm1305_vm4, %v1240_v31  ;;  %v2113_v24 = vpop.permute.xlu1 %2112  ;;  %v2239_v52 = vsel %vm490_vm0, %v2237_v46, %v2238_v49  ;;  %v537_v1 = vrot.slane %v5248_v32, 1  ;;  %v5614_v46 = vld [vmem:[#allocation5_spill] sm:$0xff] }
  0xba   :  { %v554_v17 = vpop.permute.xlu0 %553  ;;  %v2273_v37 = vsel %vm571_vm2, %v4344_v28, %v2113_v24  ;;  %v2111_v39 = vsel %vm217_vm1, %v2106_v19, %v2110_v27  ;;  %v536_v38 = vrot.slane %v3031_v9, 1  ;;  %v5615_v9 = vld [vmem:[#allocation8_spill] sm:$0xff] }
  0xbb   :  { %v620_v47 = vsel %vm604_vm3, %v587_v18, %v554_v17  ;;  %567 = vrot.lane.b32.xlu1 %v535_v15, %s3903_s17 }
  0xbc   :  { %438 = vrot.lane.b32.xlu0 %v397_v6, %s3904_s12  ;;  %3568 = vmatmul.mubr.msk.bf16.gmra.mrb[12].mxu0 %vm1305_vm4, %v620_v47  ;;  %v538_v28 = vsel %vm490_vm0, %v536_v38, %v537_v1  ;;  %v5613_v47 = vld [vmem:[#allocation6_spill] sm:$0xff] }
  0xbd   :  { %v1178_v3 = vpop.permute.xlu1 %1177 }
  0xbe   :  { %v1050_v41 = vpop.permute.xlu0 %1049 }
  0xbf   :  { %v1210_v10 = vsel %vm571_vm2, %v4374_v50, %v1050_v41  ;;  %2268 = vrot.lane.b32.xlu1 %v2236_v0, %s3903_s17 }
  0xc0   :  { %440 = vrot.lane.b32.xlu0 %v409_v57, %s3904_s12  ;;  %v1242_v63 = vsel %vm604_vm3, %v1210_v10, %v1178_v3 }
  0xc1   :  { %3527 = vmatprep.mubr.msk.bf16.mxu1 %vm1305_vm4, %v1242_v63  ;;  %v2241_v8 = vpop.permute.xlu1 %2240 }
  0xc2   :  { %v2305_v50 = vsel %vm604_vm3, %v2273_v37, %v2241_v8  ;;  %v1052_v60 = vpop.permute.xlu0 %1051 }
  0xc3   :  { %3599 = vmatprep.mubr.msk.bf16.mxu0 %vm1305_vm4, %v2305_v50  ;;  %2270 = vrot.lane.b32.xlu1 %v2239_v52, %s3903_s17  ;;  %v1212_v61 = vsel %vm571_vm2, %v4405_v14, %v1052_v60  ;;  %v5616_v52 = vld [vmem:[#allocation7_spill] sm:$0xff]  ;;  %v5617_v50 = vld [vmem:[#allocation10_spill] sm:$0xff] }
  0xc4   :  { %2142 = vrot.lane.b32.xlu0 %v2111_v39, %s3904_s12 }
  0xc5   :  { %v2243_v23 = vpop.permute.xlu1 %2242 }
  0xc6   :  { %v2115_v48 = vpop.permute.xlu0 %2114 }
  0xc7   :  { %v2275_v11 = vsel %vm571_vm2, %v4417_v5, %v2115_v48 }
  0xc8   :  { %v2307_v59 = vsel %vm604_vm3, %v2275_v11, %v2243_v23  ;;  %569 = vrot.lane.b32.xlu0 %v538_v28, %s3903_s17  ;;  %v5618_v28 = vld [vmem:[#allocation9_spill] sm:$0xff] }
  0xc9   :  { %3600 = vmatmul.mubr.msk.bf16.vlgmr.msra.gmra.mrb[0].mxu0 %vm1305_vm4, %v2307_v59  ;;  %v2117_v32 = vpop.permute.xlu1 %2116 }
  0xca   :  { %v1180_v22 = vpop.permute.xlu0 %1179  ;;  %v2277_v43 = vsel %vm571_vm2, %v4445_v45, %v2117_v32 }
  0xcb   :  { %v1244_v15 = vsel %vm604_vm3, %v1212_v61, %v1180_v22 }
  0xcc   :  { %3528 = vmatmul.mubr.msk.bf16.gmra.mrb[16].mxu1 %vm1305_vm4, %v1244_v15  ;;  %v5619_v15 = vld [vmem:[#allocation12_spill] sm:$0xff] }
  0xcd   :  { %v1182_v7 = vpop.permute.xlu1 %1181 }
  0xce   :  { %v1054_v53 = vpop.permute.xlu0 %1053 }
  0xcf   :  { %v1214_v5 = vsel %vm571_vm2, %v4470_v34, %v1054_v53 }
  0xd0   :  { %v1246_v31 = vsel %vm604_vm3, %v1214_v5, %v1182_v7 }
  0xd1   :  { %3531 = vmatprep.mubr.msk.bf16.mxu1 %vm1305_vm4, %v1246_v31  ;;  %v2245_v16 = vpop.permute.xlu1 %2244  ;;  %v5620_v31 = vld [vmem:[#allocation11_spill] sm:$0xff] }
  0xd2   :  { %v2309_v14 = vsel %vm604_vm3, %v2277_v43, %v2245_v16  ;;  %v1056_v42 = vpop.permute.xlu0 %1055 }
  0xd3   :  { %3603 = vmatprep.mubr.msk.bf16.mxu0 %vm1305_vm4, %v2309_v14  ;;  %v1216_v45 = vsel %vm571_vm2, %v4495_v33, %v1056_v42 }
  0xd5   :  { %v2247_v24 = vpop.permute.xlu1 %2246 }
  0xd6   :  { %v2119_v6 = vpop.permute.xlu0 %2118 }
  0xd7   :  { %v2279_v20 = vsel %vm571_vm2, %v4522_v62, %v2119_v6 }
  0xd8   :  { %v2311_v34 = vsel %vm604_vm3, %v2279_v20, %v2247_v24 }
  0xd9   :  { %3604 = vmatmul.mubr.msk.bf16.gmra.mrb[4].mxu0 %vm1305_vm4, %v2311_v34  ;;  %v2121_v55 = vpop.permute.xlu1 %2120  ;;  %v5621_v34 = vld [vmem:[#allocation13_spill] sm:$0xff] }
  0xda   :  { %v1184_v4 = vpop.permute.xlu0 %1183  ;;  %v2281_v49 = vsel %vm571_vm2, %v5614_v46, %v2121_v55 }
  0xdb   :  { %v1248_v18 = vsel %vm604_vm3, %v1216_v45, %v1184_v4 }
  0xdc   :  { %3532 = vmatmul.mubr.msk.bf16.gmra.mrb[20].mxu1 %vm1305_vm4, %v1248_v18 }
  0xdd   :  { %v1186_v17 = vpop.permute.xlu1 %1185 }
  0xde   :  { %v1058_v44 = vpop.permute.xlu0 %1057 }
  0xdf   :  { %v1218_v0 = vsel %vm571_vm2, %v5613_v47, %v1058_v44 }
  0xe0   :  { %v1250_v62 = vsel %vm604_vm3, %v1218_v0, %v1186_v17 }
  0xe1   :  { %3535 = vmatprep.mubr.msk.bf16.mxu1 %vm1305_vm4, %v1250_v62  ;;  %v2249_v3 = vpop.permute.xlu1 %2248 }
  0xe2   :  { %v2313_v33 = vsel %vm604_vm3, %v2281_v49, %v2249_v3  ;;  %v1060_v57 = vpop.permute.xlu0 %1059 }
  0xe3   :  { %3607 = vmatprep.mubr.msk.bf16.mxu0 %vm1305_vm4, %v2313_v33  ;;  %v1220_v37 = vsel %vm571_vm2, %v5616_v52, %v1060_v57 }
  0xe5   :  { %v2251_v19 = vpop.permute.xlu1 %2250 }
  0xe6   :  { %v2123_v27 = vpop.permute.xlu0 %2122 }
  0xe7   :  { %v2283_v41 = vsel %vm571_vm2, %v5615_v9, %v2123_v27 }
  0xe8   :  { %v2315_v10 = vsel %vm604_vm3, %v2283_v41, %v2251_v19 }
  0xe9   :  { %3608 = vmatmul.mubr.msk.bf16.gmra.mrb[8].mxu0 %vm1305_vm4, %v2315_v10  ;;  %v2125_v63 = vpop.permute.xlu1 %2124 }
  0xea   :  { %v1188_v8 = vpop.permute.xlu0 %1187  ;;  %v2285_v48 = vsel %vm571_vm2, %v5618_v28, %v2125_v63 }
  0xeb   :  { %v1252_v39 = vsel %vm604_vm3, %v1220_v37, %v1188_v8 }
  0xec   :  { %3536 = vmatmul.mubr.msk.bf16.gmra.mrb[24].mxu1 %vm1305_vm4, %v1252_v39 }
  0xed   :  { %v1190_v38 = vpop.permute.xlu1 %1189 }
  0xee   :  { %v1062_v1 = vpop.permute.xlu0 %1061 }
  0xef   :  { %v1222_v60 = vsel %vm571_vm2, %v5617_v50, %v1062_v1 }
  0xf0   :  { %v1254_v23 = vsel %vm604_vm3, %v1222_v60, %v1190_v38 }
  0xf1   :  { %3539 = vmatprep.mubr.msk.bf16.mxu1 %vm1305_vm4, %v1254_v23  ;;  %v2253_v11 = vpop.permute.xlu1 %2252 }
  0xf2   :  { %v2317_v59 = vsel %vm604_vm3, %v2285_v48, %v2253_v11  ;;  %v1064_v32 = vpop.permute.xlu0 %1063 }
  0xf3   :  { %3611 = vmatprep.mubr.msk.bf16.mxu0 %vm1305_vm4, %v2317_v59  ;;  %v1224_v43 = vsel %vm571_vm2, %v5620_v31, %v1064_v32 }
  0xf5   :  { %v2255_v61 = vpop.permute.xlu1 %2254 }
  0xf6   :  { %v2127_v22 = vpop.permute.xlu0 %2126 }
  0xf7   :  { %v2287_v7 = vsel %vm571_vm2, %v5619_v15, %v2127_v22 }
  0xf8   :  { %v2319_v53 = vsel %vm604_vm3, %v2287_v7, %v2255_v61 }
  0xf9   :  { %3612 = vmatmul.mubr.msk.bf16.gmra.mrb[12].mxu0 %vm1305_vm4, %v2319_v53  ;;  %v2129_v5 = vpop.permute.xlu1 %2128 }
  0xfa   :  { %v1192_v16 = vpop.permute.xlu0 %1191  ;;  %v2289_v55 = vsel %vm571_vm2, %v5621_v34, %v2129_v5 }
  0xfb   :  { %v1256_v14 = vsel %vm604_vm3, %v1224_v43, %v1192_v16 }
  0xfc   :  { %3540 = vmatmul.mubr.msk.bf16.gmra.mrb[28].mxu1 %vm1305_vm4, %v1256_v14 }
  0xfd   :  { %v556_v42 = vpop.permute.xlu1 %555 }
  0xfe   :  { %v427_v24 = vpop.permute.xlu0 %426 }
  0xff   :  { %v589_v6 = vsel %vm571_vm2, %v4769_v36, %v427_v24 }
 0x100   :  { %v622_v20 = vsel %vm604_vm3, %v589_v6, %v556_v42 }
 0x101   :  { %3571 = vmatprep.mubr.msk.bf16.mxu1 %vm1305_vm4, %v622_v20  ;;  %v2257_v45 = vpop.permute.xlu1 %2256 }
 0x102   :  { %v2321_v4 = vsel %vm604_vm3, %v2289_v55, %v2257_v45  ;;  %v429_v18 = vpop.permute.xlu0 %428 }
 0x103   :  { %3615 = vmatprep.mubr.msk.bf16.mxu0 %vm1305_vm4, %v2321_v4  ;;  %v591_v62 = vsel %vm571_vm2, %v4803_v51, %v429_v18 }
 0x105   :  { %v2259_v17 = vpop.permute.xlu1 %2258 }
 0x106   :  { %v2131_v44 = vpop.permute.xlu0 %2130 }
 0x107   :  { %v2291_v47 = vsel %vm571_vm2, %v4847_v2, %v2131_v44 }
 0x108   :  { %v2323_v36 = vsel %vm604_vm3, %v2291_v47, %v2259_v17 }
 0x109   :  { %3616 = vmatmul.mubr.msk.bf16.gmra.mrb[16].mxu0 %vm1305_vm4, %v2323_v36  ;;  %v2133_v0 = vpop.permute.xlu1 %2132 }
 0x10a   :  { %v558_v46 = vpop.permute.xlu0 %557  ;;  %v2293_v19 = vsel %vm571_vm2, %v4863_v26, %v2133_v0 }
 0x10b   :  { %v624_v49 = vsel %vm604_vm3, %v591_v62, %v558_v46 }
 0x10c   :  { %3572 = vmatmul.mubr.msk.bf16.vlgmr.msra.gmra.mrb[16].mxu1 %vm1305_vm4, %v624_v49  ;;  %v3403_v49 = vld [vmem:[%s5593_s5 + $0x8] sm:$0xff]  }
 0x10d   :  { %v560_v3 = vpop.permute.xlu1 %559 }
 0x10e   :  { %v431_v33 = vpop.permute.xlu0 %430 }
 0x10f   :  { %v593_v57 = vsel %vm571_vm2, %v4903_v56, %v431_v33  ;;  %v3265_v33 = vunpack.c.l.bf16 %v3403_v49 }
 0x110   :  { %v626_v2 = vsel %vm604_vm3, %v593_v57, %v560_v3  ;;  %v3260_v3 = vld [vmem:[%s5593_s5] sm:$0xff]  }
 0x111   :  { %3575 = vmatprep.mubr.msk.bf16.mxu1 %vm1305_vm4, %v626_v2  ;;  %v2261_v27 = vpop.permute.xlu1 %2260  ;;  %v3261_v57 = vunpack.c.l.bf16 %v3260_v3 }
 0x112   :  { %v2325_v51 = vsel %vm604_vm3, %v2293_v19, %v2261_v27  ;;  %v433_v9 = vpop.permute.xlu0 %432  ;;  %v5458_v19 = vld [vmem:[%s5592_s4] ss:$0 sm:$0xff]  ;;  %v3266_v27 = vunpack.c.h.bf16 %v3403_v49 }
 0x113   :  { %3619 = vmatprep.mubr.msk.bf16.mxu0 %vm1305_vm4, %v2325_v51  ;;  %v595_v26 = vsel %vm571_vm2, %v4949_v12, %v433_v9 }
 0x115   :  { %v2263_v41 = vpop.permute.xlu1 %2262 }
 0x116   :  { %v2135_v10 = vpop.permute.xlu0 %2134 }
 0x117   :  { %v2295_v63 = vsel %vm571_vm2, %v4970_v58, %v2135_v10  ;;  %v2714_v10 = vsel %vm571_vm2, %v3265_v33, 0.0 }
 0x118   :  { %v2327_v56 = vsel %vm604_vm3, %v2295_v63, %v2263_v41  ;;  %v3262_v41 = vunpack.c.h.bf16 %v3260_v3 }
 0x119   :  { %3620 = vmatmul.mubr.msk.bf16.gmra.mrb[20].mxu0 %vm1305_vm4, %v2327_v56  ;;  %v2137_v52 = vpop.permute.xlu1 %2136 }
 0x11a   :  { %v562_v37 = vpop.permute.xlu0 %561  ;;  %v2297_v50 = vsel %vm571_vm2, %v5013_v25, %v2137_v52 }
 0x11b   :  { %v628_v8 = vsel %vm604_vm3, %v595_v26, %v562_v37  ;;  %v2712_v26 = vsel %vm571_vm2, %v3261_v57, 0.0 }
 0x11c   :  { %3576 = vmatmul.mubr.msk.bf16.gmra.mrb[20].mxu1 %vm1305_vm4, %v628_v8 }
 0x11d   :  { %v564_v39 = vpop.permute.xlu1 %563 }
 0x11e   :  { %v435_v38 = vpop.permute.xlu0 %434 }
 0x11f   :  { %v597_v1 = vsel %vm571_vm2, %v5063_v21, %v435_v38  ;;  %v2715_v38 = vsel %vm571_vm2, %v3266_v27, 0.0 }
 0x120   :  { %v630_v58 = vsel %vm604_vm3, %v597_v1, %v564_v39 }
 0x121   :  { %3579 = vmatprep.mubr.msk.bf16.mxu1 %vm1305_vm4, %v630_v58  ;;  %v2265_v60 = vpop.permute.xlu1 %2264 }
 0x122   :  { %v2329_v12 = vsel %vm604_vm3, %v2297_v50, %v2265_v60  ;;  %v437_v23 = vpop.permute.xlu0 %436  ;;  %v2713_v60 = vsel %vm571_vm2, %v3262_v41, 0.0 }
 0x123   :  { %3623 = vmatprep.mubr.msk.bf16.mxu0 %vm1305_vm4, %v2329_v12  ;;  %v599_v25 = vsel %vm571_vm2, %v5100_v54, %v437_v23 }
 0x125   :  { %v2267_v28 = vpop.permute.xlu1 %2266 }
 0x126   :  { %v2139_v48 = vpop.permute.xlu0 %2138 }
 0x127   :  { %v2299_v11 = vsel %vm571_vm2, %v5131_v40, %v2139_v48 }
 0x128   :  { %v2331_v21 = vsel %vm604_vm3, %v2299_v11, %v2267_v28 }
 0x129   :  { %3624 = vmatmul.mubr.msk.bf16.gmra.mrb[24].mxu0 %vm1305_vm4, %v2331_v21  ;;  %v2141_v59 = vpop.permute.xlu1 %2140 }
 0x12a   :  { %v566_v32 = vpop.permute.xlu0 %565  ;;  %v2301_v53 = vsel %vm571_vm2, %v5162_v35, %v2141_v59 }
 0x12b   :  { %v632_v61 = vsel %vm604_vm3, %v599_v25, %v566_v32 }
 0x12c   :  { %3580 = vmatmul.mubr.msk.bf16.gmra.mrb[24].mxu1 %vm1305_vm4, %v632_v61  ;;  %v3405_v61 = vld [vmem:[%s5593_s5 + $0x18] sm:$0xff]  }
 0x12d   :  { %v568_v22 = vpop.permute.xlu1 %567 }
 0x12e   :  { %v439_v15 = vpop.permute.xlu0 %438 }
 0x12f   :  { %v601_v7 = vsel %vm571_vm2, %v5193_v13, %v439_v15  ;;  %v3404_v15 = vld [vmem:[%s5593_s5 + $0x10] sm:$0xff]  }
 0x130   :  { %v634_v40 = vsel %vm604_vm3, %v601_v7, %v568_v22  ;;  %v3273_v7 = vunpack.c.l.bf16 %v3405_v61 }
 0x131   :  { %3583 = vmatprep.mubr.msk.bf16.mxu1 %vm1305_vm4, %v634_v40  ;;  %v2269_v5 = vpop.permute.xlu1 %2268  ;;  %v3269_v40 = vunpack.c.l.bf16 %v3404_v15 }
 0x132   :  { %v2333_v54 = vsel %vm604_vm3, %v2301_v53, %v2269_v5  ;;  %v441_v31 = vpop.permute.xlu0 %440  ;;  %v3274_v5 = vunpack.c.h.bf16 %v3405_v61 }
 0x133   :  { %3627 = vmatprep.mubr.msk.bf16.mxu0 %vm1305_vm4, %v2333_v54  ;;  %v603_v35 = vsel %vm571_vm2, %v5222_v29, %v441_v31 }
 0x135   :  { %v2271_v43 = vpop.permute.xlu1 %2270 }
 0x136   :  { %v2143_v16 = vpop.permute.xlu0 %2142 }
 0x137   :  { %v2303_v14 = vsel %vm571_vm2, %v5255_v30, %v2143_v16  ;;  %v2718_v16 = vsel %vm571_vm2, %v3273_v7, 0.0 }
 0x138   :  { %v2335_v13 = vsel %vm604_vm3, %v2303_v14, %v2271_v43  ;;  %v3270_v43 = vunpack.c.h.bf16 %v3404_v15 }
 0x139   :  { %3628 = vmatmul.mubr.msk.bf16.gmra.mrb[28].mxu0 %vm1305_vm4, %v2335_v13 }
 0x13a   :  { %v570_v42 = vpop.permute.xlu0 %569  ;;  %v2717_v3 = vsel %vm571_vm2, %v3270_v43, 0.0 }
 0x13b   :  { %v636_v24 = vsel %vm604_vm3, %v603_v35, %v570_v42  ;;  %v2716_v42 = vsel %vm571_vm2, %v3269_v40, 0.0 }
 0x13c   :  { %3584 = vmatmul.mubr.msk.bf16.gmra.mrb[28].mxu1 %vm1305_vm4, %v636_v24 }
 0x15c   :  { %v3513_v6 = vpop.f32.mrb[0].mxu1 }
 0x15d   :  { %v1372_v20 = vpop.f32.mrb[1].mxu1 }
 0x15e   :  { %v3514_v34 = vpop.f32.mrb[2].mxu1 }
 0x15f   :  { %v1375_v55 = vpop.f32.mrb[3].mxu1 }
 0x16c   :  { %v3517_v45 = vpop.f32.mrb[4].mxu1 }
 0x16d   :  { %v1388_v4 = vpop.f32.mrb[5].mxu1 }
 0x16e   :  { %v3518_v18 = vpop.f32.mrb[6].mxu1 }
 0x16f   :  { %v1391_v30 = vpop.f32.mrb[7].mxu1 }
 0x17c   :  { %v5433_v17 = vpop.f32.mrb[8].mxu1 }
 0x17d   :  { %v5435_v44 = vpop.f32.mrb[9].mxu1 }
 0x17e   :  { %v5437_v47 = vpop.f32.mrb[10].mxu1 }
 0x17f   :  { %v5439_v29 = vpop.f32.mrb[11].mxu1 }
 0x18c   :  { %v5441_v36 = vpop.f32.mrb[12].mxu1 }
 0x18d   :  { %v5443_v0 = vpop.f32.mrb[13].mxu1 }
 0x18e   :  { %v5445_v62 = vpop.f32.mrb[14].mxu1 }
 0x18f   :  { %v5447_v46 = vpop.f32.mrb[15].mxu1 }
 0x19c   :  { %v3601_v2 = vpop.f32.mrb[0].mxu0 }
 0x19d   :  { %v3643_v51 = vadd.f32 %v3601_v2, %v3513_v6  ;;  %v2450_v9 = vpop.f32.mrb[1].mxu0 }
 0x19e   :  { %v3644_v63 = vadd.f32 %v2450_v9, %v1372_v20  ;;  %v3602_v56 = vpop.f32.mrb[2].mxu0 }
 0x19f   :  { %v2618_v52 = vadd.f32 %v3643_v51, %v5458_v19  ;;  %v3645_v37 = vadd.f32 %v3602_v56, %v3514_v34  ;;  %v2453_v8 = vpop.f32.mrb[3].mxu0  ;;  %v2719_v34 = vsel %vm571_vm2, %v3274_v5, 0.0  ;;  %v3409_v5 = vld [vmem:[%s5593_s5 + $0x38] sm:$0xff]  }
 0x1a0   :  { %v2616_v39 = vadd.f32 %v3644_v63, %v5458_v19  ;;  %v3646_v1 = vadd.f32 %v2453_v8, %v1375_v55  ;;  %v3406_v63 = vld [vmem:[%s5593_s5 + $0x20] sm:$0xff]  }
 0x1a1   :  { %v2746_v58 = vadd.f32 %v2714_v10, %v2618_v52  ;;  %v2619_v50 = vadd.f32 %v3645_v37, %v5458_v19  ;;  %v3407_v10 = vld [vmem:[%s5593_s5 + $0x28] sm:$0xff]   ;;  %v3277_v52 = vunpack.c.l.bf16 %v3406_v63 }
 0x1a2   :  { %v2744_v12 = vadd.f32 %v2712_v26, %v2616_v39  ;;  %v2617_v23 = vadd.f32 %v3646_v1, %v5458_v19  ;;  %v3281_v56 = vunpack.c.l.bf16 %v3407_v10  ;;  %v3282_v37 = vunpack.c.h.bf16 %v3407_v10 }
 0x1a3   :  { %v2747_v28 = vadd.f32 %v2715_v38, %v2619_v50  ;;  %v2778_v11 = vmax.f32 %v2746_v58, 0.0  ;;  %v3278_v38 = vunpack.c.h.bf16 %v3406_v63 }
 0x1a4   :  { %v2745_v48 = vadd.f32 %v2713_v60, %v2617_v23  ;;  %v2776_v59 = vmax.f32 %v2744_v12, 0.0  ;;  %v2722_v1 = vsel %vm571_vm2, %v3281_v56, 0.0  ;;  %v2720_v12 = vsel %vm571_vm2, %v3277_v52, 0.0  ;;  %v3410_v56 = vld [vmem:[%s5593_s5 + $0x40] sm:$0xff]  }
 0x1a5   :  { %v2779_v21 = vmax.f32 %v2747_v28, 0.0 }
 0x1a6   :  { %v2777_v25 = vmax.f32 %v2745_v48, 0.0 }
 0x1a7   :  { %v3331_v32 = vpack.c.bf16 %v2779_v21, %v2778_v11  ;;  %v2723_v11 = vsel %vm571_vm2, %v3282_v37, 0.0 }
 0x1a8   :  { %v3326_v22 = vpack.c.bf16 %v2777_v25, %v2776_v59  ;;  %v2721_v25 = vsel %vm571_vm2, %v3278_v38, 0.0 }
 0x1a9   :  { %3418 = vst [vmem:[#allocation2 + $0x8] sm:$0xff] %v3331_v32  }
 0x1aa   :  { %3327 = vst [vmem:[#allocation2] sm:$0xff] %v3326_v22  }
 0x1ac   :  { %v3605_v53 = vpop.f32.mrb[4].mxu0 }
 0x1ad   :  { %v3647_v54 = vadd.f32 %v3605_v53, %v3517_v45  ;;  %v2466_v31 = vpop.f32.mrb[5].mxu0 }
 0x1ae   :  { %v3648_v14 = vadd.f32 %v2466_v31, %v1388_v4  ;;  %v3606_v13 = vpop.f32.mrb[6].mxu0  ;;  %v3289_v31 = vunpack.c.l.bf16 %v3409_v5 }
 0x1af   :  { %v2622_v35 = vadd.f32 %v3647_v54, %v5458_v19  ;;  %v3649_v24 = vadd.f32 %v3606_v13, %v3518_v18  ;;  %v2469_v6 = vpop.f32.mrb[7].mxu0  ;;  %v3408_v54 = vld [vmem:[%s5593_s5 + $0x30] sm:$0xff]  }
 0x1b0   :  { %v2620_v20 = vadd.f32 %v3648_v14, %v5458_v19  ;;  %v3650_v55 = vadd.f32 %v2469_v6, %v1391_v30  ;;  %v3285_v43 = vunpack.c.l.bf16 %v3408_v54  ;;  %v3290_v14 = vunpack.c.h.bf16 %v3409_v5 }
 0x1b1   :  { %v2750_v49 = vadd.f32 %v2718_v16, %v2622_v35  ;;  %v2623_v45 = vadd.f32 %v3649_v24, %v5458_v19  ;;  %v2726_v24 = vsel %vm571_vm2, %v3289_v31, 0.0 }
 0x1b2   :  { %v2748_v33 = vadd.f32 %v2716_v42, %v2620_v20  ;;  %v2621_v4 = vadd.f32 %v3650_v55, %v5458_v19  ;;  %v3286_v42 = vunpack.c.h.bf16 %v3408_v54  ;;  %v2724_v55 = vsel %vm571_vm2, %v3285_v43, 0.0 }
 0x1b3   :  { %v2751_v57 = vadd.f32 %v2719_v34, %v2623_v45  ;;  %v2782_v27 = vmax.f32 %v2750_v49, 0.0 }
 0x1b4   :  { %v2749_v2 = vadd.f32 %v2717_v3, %v2621_v4  ;;  %v2780_v9 = vmax.f32 %v2748_v33, 0.0  ;;  %v2727_v33 = vsel %vm571_vm2, %v3290_v14, 0.0 }
 0x1b5   :  { %v2783_v51 = vmax.f32 %v2751_v57, 0.0 }
 0x1b6   :  { %v2781_v18 = vmax.f32 %v2749_v2, 0.0  ;;  %v2725_v2 = vsel %vm571_vm2, %v3286_v42, 0.0 }
 0x1b7   :  { %v3341_v41 = vpack.c.bf16 %v2783_v51, %v2782_v27 }
 0x1b8   :  { %v3336_v30 = vpack.c.bf16 %v2781_v18, %v2780_v9 }
 0x1b9   :  { %3420 = vst [vmem:[#allocation2 + $0x18] sm:$0xff] %v3341_v41  }
 0x1ba   :  { %3419 = vst [vmem:[#allocation2 + $0x10] sm:$0xff] %v3336_v30  }
 0x1bc   :  { %v3609_v26 = vpop.f32.mrb[8].mxu0 }
 0x1bd   :  { %v3651_v8 = vadd.f32 %v3609_v26, %v5433_v17  ;;  %v2482_v39 = vpop.f32.mrb[9].mxu0 }
 0x1be   :  { %v3652_v58 = vadd.f32 %v2482_v39, %v5435_v44  ;;  %v3610_v50 = vpop.f32.mrb[10].mxu0  ;;  %v3293_v39 = vunpack.c.l.bf16 %v3410_v56 }
 0x1bf   :  { %v2626_v60 = vadd.f32 %v3651_v8, %v5458_v19  ;;  %v3653_v23 = vadd.f32 %v3610_v50, %v5437_v47  ;;  %v2485_v28 = vpop.f32.mrb[11].mxu0 }
 0x1c0   :  { %v2624_v48 = vadd.f32 %v3652_v58, %v5458_v19  ;;  %v3654_v17 = vadd.f32 %v2485_v28, %v5439_v29 }
 0x1c1   :  { %v2754_v21 = vadd.f32 %v2722_v1, %v2626_v60  ;;  %v2627_v59 = vadd.f32 %v3653_v23, %v5458_v19 }
 0x1c2   :  { %v2752_v44 = vadd.f32 %v2720_v12, %v2624_v48  ;;  %v2625_v32 = vadd.f32 %v3654_v17, %v5458_v19  ;;  %v3294_v12 = vunpack.c.h.bf16 %v3410_v56  ;;  %v2728_v17 = vsel %vm571_vm2, %v3293_v39, 0.0 }
 0x1c3   :  { %v2755_v61 = vadd.f32 %v2723_v11, %v2627_v59  ;;  %v2786_v15 = vmax.f32 %v2754_v21, 0.0 }
 0x1c4   :  { %v2753_v22 = vadd.f32 %v2721_v25, %v2625_v32  ;;  %v2784_v47 = vmax.f32 %v2752_v44, 0.0 }
 0x1c5   :  { %v2787_v7 = vmax.f32 %v2755_v61, 0.0 }
 0x1c6   :  { %v2785_v40 = vmax.f32 %v2753_v22, 0.0 }
 0x1c7   :  { %v3351_v53 = vpack.c.bf16 %v2787_v7, %v2786_v15  ;;  %v2729_v15 = vsel %vm571_vm2, %v3294_v12, 0.0 }
 0x1c8   :  { %v3346_v29 = vpack.c.bf16 %v2785_v40, %v2784_v47 }
 0x1c9   :  { %3422 = vst [vmem:[#allocation2 + $0x28] sm:$0xff] %v3351_v53  }
 0x1ca   :  { %3421 = vst [vmem:[#allocation2 + $0x20] sm:$0xff] %v3346_v29  }
 0x1cc   :  { %v3613_v16 = vpop.f32.mrb[12].mxu0 }
 0x1cd   :  { %v3655_v13 = vadd.f32 %v3613_v16, %v5441_v36  ;;  %v2498_v35 = vpop.f32.mrb[13].mxu0  ;;  %v3413_v16 = vld [vmem:[%s5593_s5 + $0x58] sm:$0xff]  }
 0x1ce   :  { %v3656_v6 = vadd.f32 %v2498_v35, %v5443_v0  ;;  %v3614_v20 = vpop.f32.mrb[14].mxu0 }
 0x1cf   :  { %v2630_v34 = vadd.f32 %v3655_v13, %v5458_v19  ;;  %v3657_v49 = vadd.f32 %v3614_v20, %v5445_v62  ;;  %v2501_v45 = vpop.f32.mrb[15].mxu0  ;;  %v3412_v13 = vld [vmem:[%s5593_s5 + $0x50] sm:$0xff]  }
 0x1d0   :  { %v2628_v3 = vadd.f32 %v3656_v6, %v5458_v19  ;;  %v3658_v36 = vadd.f32 %v2501_v45, %v5447_v46  ;;  %v3411_v46 = vld [vmem:[%s5593_s5 + $0x48] sm:$0xff]   ;;  %v3301_v20 = vunpack.c.l.bf16 %v3412_v13 }
 0x1d1   :  { %v2758_v4 = vadd.f32 %v2726_v24, %v2630_v34  ;;  %v2631_v57 = vadd.f32 %v3657_v49, %v5458_v19  ;;  %v3297_v37 = vunpack.c.l.bf16 %v3411_v46  ;;  %v3298_v58 = vunpack.c.h.bf16 %v3411_v46 }
 0x1d2   :  { %v2756_v0 = vadd.f32 %v2724_v55, %v2628_v3  ;;  %v2629_v27 = vadd.f32 %v3658_v36, %v5458_v19  ;;  %v3305_v24 = vunpack.c.l.bf16 %v3413_v16  ;;  %v3306_v49 = vunpack.c.h.bf16 %v3413_v16 }
 0x1d3   :  { %v2759_v51 = vadd.f32 %v2727_v33, %v2631_v57  ;;  %v2790_v18 = vmax.f32 %v2758_v4, 0.0  ;;  %v2730_v23 = vsel %vm571_vm2, %v3297_v37, 0.0  ;;  %v2731_v44 = vsel %vm571_vm2, %v3298_v58, 0.0 }
 0x1d4   :  { %v2757_v9 = vadd.f32 %v2725_v2, %v2629_v27  ;;  %v2788_v62 = vmax.f32 %v2756_v0, 0.0  ;;  %v3302_v33 = vunpack.c.h.bf16 %v3412_v13  ;;  %v2734_v36 = vsel %vm571_vm2, %v3305_v24, 0.0 }
 0x1d5   :  { %v2791_v41 = vmax.f32 %v2759_v51, 0.0  ;;  %v2732_v0 = vsel %vm571_vm2, %v3301_v20, 0.0 }
 0x1d6   :  { %v2789_v10 = vmax.f32 %v2757_v9, 0.0 }
 0x1d7   :  { %v3361_v30 = vpack.c.bf16 %v2791_v41, %v2790_v18  ;;  %v2735_v18 = vsel %vm571_vm2, %v3306_v49, 0.0 }
 0x1d8   :  { %v3356_v63 = vpack.c.bf16 %v2789_v10, %v2788_v62 }
 0x1d9   :  { %3424 = vst [vmem:[#allocation2 + $0x38] sm:$0xff] %v3361_v30   ;;  %v2733_v30 = vsel %vm571_vm2, %v3302_v33, 0.0 }
 0x1da   :  { %3423 = vst [vmem:[#allocation2 + $0x30] sm:$0xff] %v3356_v63  }
 0x1dc   :  { %v3617_v52 = vpop.f32.mrb[16].mxu0 }
 0x1dd   :  { %v2514_v26 = vpop.f32.mrb[17].mxu0 }
 0x1de   :  { %v3618_v8 = vpop.f32.mrb[18].mxu0 }
 0x1df   :  { %v3573_v38 = vpop.f32.mrb[16].mxu1  ;;  %v2517_v1 = vpop.f32.mrb[19].mxu0 }
 0x1e0   :  { %v3659_v50 = vadd.f32 %v3617_v52, %v3573_v38  ;;  %v1665_v60 = vpop.f32.mrb[17].mxu1 }
 0x1e1   :  { %v3660_v28 = vadd.f32 %v2514_v26, %v1665_v60  ;;  %v3574_v48 = vpop.f32.mrb[18].mxu1 }
 0x1e2   :  { %v2634_v11 = vadd.f32 %v3659_v50, %v5458_v19  ;;  %v3661_v21 = vadd.f32 %v3618_v8, %v3574_v48  ;;  %v1668_v59 = vpop.f32.mrb[19].mxu1  ;;  %v3414_v50 = vld [vmem:[%s5593_s5 + $0x60] sm:$0xff]  }
 0x1e3   :  { %v2632_v25 = vadd.f32 %v3660_v28, %v5458_v19  ;;  %v3662_v32 = vadd.f32 %v2517_v1, %v1668_v59  ;;  %v3415_v1 = vld [vmem:[%s5593_s5 + $0x68] sm:$0xff]   ;;  %v3309_v48 = vunpack.c.l.bf16 %v3414_v50 }
 0x1e4   :  { %v2762_v61 = vadd.f32 %v2730_v23, %v2634_v11  ;;  %v2635_v22 = vadd.f32 %v3661_v21, %v5458_v19  ;;  %v3313_v23 = vunpack.c.l.bf16 %v3415_v1  ;;  %v3314_v21 = vunpack.c.h.bf16 %v3415_v1 }
 0x1e5   :  { %v2760_v7 = vadd.f32 %v2728_v17, %v2632_v25  ;;  %v2633_v47 = vadd.f32 %v3662_v32, %v5458_v19 }
 0x1e6   :  { %v2763_v40 = vadd.f32 %v2731_v44, %v2635_v22  ;;  %v2794_v5 = vmax.f32 %v2762_v61, 0.0  ;;  %v3310_v44 = vunpack.c.h.bf16 %v3414_v50  ;;  %v2738_v32 = vsel %vm571_vm2, %v3313_v23, 0.0 }
 0x1e7   :  { %v2761_v53 = vadd.f32 %v2729_v15, %v2633_v47  ;;  %v2792_v54 = vmax.f32 %v2760_v7, 0.0  ;;  %v2736_v7 = vsel %vm571_vm2, %v3309_v48, 0.0 }
 0x1e8   :  { %v2795_v29 = vmax.f32 %v2763_v40, 0.0 }
 0x1e9   :  { %v2793_v31 = vmax.f32 %v2761_v53, 0.0 }
 0x1ea   :  { %v3371_v43 = vpack.c.bf16 %v2795_v29, %v2794_v5  ;;  %v2739_v5 = vsel %vm571_vm2, %v3314_v21, 0.0 }
 0x1eb   :  { %v3366_v14 = vpack.c.bf16 %v2793_v31, %v2792_v54 }
 0x1ec   :  { %3426 = vst [vmem:[#allocation2 + $0x48] sm:$0xff] %v3371_v43   ;;  %v3621_v35 = vpop.f32.mrb[20].mxu0  ;;  %v2737_v43 = vsel %vm571_vm2, %v3310_v44, 0.0 }
 0x1ed   :  { %3425 = vst [vmem:[#allocation2 + $0x40] sm:$0xff] %v3366_v14   ;;  %v2530_v42 = vpop.f32.mrb[21].mxu0 }
 0x1ee   :  { %v3622_v6 = vpop.f32.mrb[22].mxu0 }
 0x1ef   :  { %v3577_v34 = vpop.f32.mrb[20].mxu1  ;;  %v2533_v55 = vpop.f32.mrb[23].mxu0 }
 0x1f0   :  { %v3663_v45 = vadd.f32 %v3621_v35, %v3577_v34  ;;  %v1681_v3 = vpop.f32.mrb[21].mxu1 }
 0x1f1   :  { %v3664_v4 = vadd.f32 %v2530_v42, %v1681_v3  ;;  %v3578_v57 = vpop.f32.mrb[22].mxu1 }
 0x1f2   :  { %v2638_v2 = vadd.f32 %v3663_v45, %v5458_v19  ;;  %v3665_v27 = vadd.f32 %v3622_v6, %v3578_v57  ;;  %v1684_v51 = vpop.f32.mrb[23].mxu1  ;;  %v3416_v45 = vld [vmem:[%s5593_s5 + $0x70] sm:$0xff]  }
 0x1f3   :  { %v2636_v9 = vadd.f32 %v3664_v4, %v5458_v19  ;;  %v3666_v41 = vadd.f32 %v2533_v55, %v1684_v51  ;;  %v3417_v55 = vld [vmem:[%s5593_s5 + $0x78] sm:$0xff]   ;;  %v3317_v57 = vunpack.c.l.bf16 %v3416_v45  ;;  %s3905_s5 = smov [#allocation2]  }
 0x1f4   :  { %v2766_v62 = vadd.f32 %v2734_v36, %v2638_v2  ;;  %v2639_v10 = vadd.f32 %v3665_v27, %v5458_v19  ;;  %v3321_v36 = vunpack.c.l.bf16 %v3417_v55  ;;  %v3322_v27 = vunpack.c.h.bf16 %v3417_v55  ;;  %s2973_s4 = sshll.u32 %s3905_s5, 4  ;;  %s2974_s4 = int_to_ptr.vmem [resolvable:$true] %s2973_s4 }
 0x1f5   :  { %v2764_v63 = vadd.f32 %v2732_v0, %v2636_v9  ;;  %v2637_v46 = vadd.f32 %v3666_v41, %v5458_v19  ;;  %s3879_s29 = scalar_lea.vmem %s2974_s4, 2048  ;;  %p3884_p1 = scmp.lt.s32.totalorder %s2974_s4, %s2974_s4 }
 0x1f6   :  { %v2767_v56 = vadd.f32 %v2735_v18, %v2639_v10  ;;  %v2798_v26 = vmax.f32 %v2766_v62, 0.0  ;;  %v3318_v18 = vunpack.c.h.bf16 %v3416_v45  ;;  %v2742_v41 = vsel %vm571_vm2, %v3321_v36, 0.0  ;;  %p3880_p0 = scmp.ne.s32.totalorder %s2974_s4, %s3879_s29  ;;  %p3885_p2 = scmp.lt.s32.totalorder %s3879_s29, %s3879_s29 }
 0x1f7   :  { %v2765_v52 = vadd.f32 %v2733_v30, %v2637_v46  ;;  %v2796_v8 = vmax.f32 %v2764_v63, 0.0  ;;  %v2740_v63 = vsel %vm571_vm2, %v3317_v57, 0.0 }
 0x1f8   :  { %v2799_v37 = vmax.f32 %v2767_v56, 0.0  ;;  %p3886_p3 = por %p3885_p2, %p3884_p1 }
 0x1f9   :  { %v2797_v39 = vmax.f32 %v2765_v52, 0.0 }
 0x1fa   :  { %v3381_v38 = vpack.c.bf16 %v2799_v37, %v2798_v26  ;;  %v2743_v26 = vsel %vm571_vm2, %v3322_v27, 0.0  ;;  %p3887_p4 = pnand %p3886_p3, %p3880_p0 }
 0x1fb   :  { %v3376_v58 = vpack.c.bf16 %v2797_v39, %v2796_v8 }
 0x1fc   :  { %3428 = vst [vmem:[#allocation2 + $0x58] sm:$0xff] %v3381_v38   ;;  %v3625_v60 = vpop.f32.mrb[24].mxu0  ;;  %v2741_v38 = vsel %vm571_vm2, %v3318_v18, 0.0 }
 0x1fd   :  { %3427 = vst [vmem:[#allocation2 + $0x50] sm:$0xff] %v3376_v58   ;;  %v2546_v12 = vpop.f32.mrb[25].mxu0 }
 0x1fe   :  { %v3626_v28 = vpop.f32.mrb[26].mxu0 }
 0x1ff   :  { %v3581_v11 = vpop.f32.mrb[24].mxu1  ;;  %v2549_v17 = vpop.f32.mrb[27].mxu0 }
 0x200   :  { %v3667_v59 = vadd.f32 %v3625_v60, %v3581_v11  ;;  %v1697_v25 = vpop.f32.mrb[25].mxu1 }
 0x201   :  { %v3668_v61 = vadd.f32 %v2546_v12, %v1697_v25  ;;  %v3582_v22 = vpop.f32.mrb[26].mxu1 }
 0x202   :  { %v2642_v15 = vadd.f32 %v3667_v59, %v5458_v19  ;;  %v3669_v47 = vadd.f32 %v3626_v28, %v3582_v22  ;;  %v1700_v40 = vpop.f32.mrb[27].mxu1 }
 0x203   :  { %v2640_v53 = vadd.f32 %v3668_v61, %v5458_v19  ;;  %v3670_v29 = vadd.f32 %v2549_v17, %v1700_v40 }
 0x204   :  { %v2770_v54 = vadd.f32 %v2738_v32, %v2642_v15  ;;  %v2643_v31 = vadd.f32 %v3669_v47, %v5458_v19 }
 0x205   :  { %v2768_v16 = vadd.f32 %v2736_v7, %v2640_v53  ;;  %v2641_v14 = vadd.f32 %v3670_v29, %v5458_v19 }
 0x206   :  { %v2771_v13 = vadd.f32 %v2739_v5, %v2643_v31  ;;  %v2802_v42 = vmax.f32 %v2770_v54, 0.0 }
 0x207   :  { %v2769_v35 = vadd.f32 %v2737_v43, %v2641_v14  ;;  %v2800_v6 = vmax.f32 %v2768_v16, 0.0 }
 0x208   :  { %v2803_v24 = vmax.f32 %v2771_v13, 0.0 }
 0x209   :  { %v2801_v20 = vmax.f32 %v2769_v35, 0.0 }
 0x20a   :  { %v3391_v34 = vpack.c.bf16 %v2803_v24, %v2802_v42 }
 0x20b   :  { %v3386_v49 = vpack.c.bf16 %v2801_v20, %v2800_v6 }
 0x20c   :  { %3430 = vst [vmem:[#allocation2 + $0x68] sm:$0xff] %v3391_v34   ;;  %v3629_v3 = vpop.f32.mrb[28].mxu0 }
 0x20d   :  { %3429 = vst [vmem:[#allocation2 + $0x60] sm:$0xff] %v3386_v49   ;;  %v2562_v33 = vpop.f32.mrb[29].mxu0 }
 0x20e   :  { %v3630_v4 = vpop.f32.mrb[30].mxu0 }
 0x20f   :  { %v3585_v2 = vpop.f32.mrb[28].mxu1  ;;  %v2565_v0 = vpop.f32.mrb[31].mxu0 }
 0x210   :  { %v3671_v51 = vadd.f32 %v3629_v3, %v3585_v2  ;;  %v1713_v9 = vpop.f32.mrb[29].mxu1 }
 0x211   :  { %v3672_v62 = vadd.f32 %v2562_v33, %v1713_v9  ;;  %v3586_v10 = vpop.f32.mrb[30].mxu1 }
 0x212   :  { %v2646_v30 = vadd.f32 %v3671_v51, %v5458_v19  ;;  %v3673_v46 = vadd.f32 %v3630_v4, %v3586_v10  ;;  %v1716_v56 = vpop.f32.mrb[31].mxu1 }
 0x213   :  { %v2644_v52 = vadd.f32 %v3672_v62, %v5458_v19  ;;  %v3674_v37 = vadd.f32 %v2565_v0, %v1716_v56 }
 0x214   :  { %v2774_v8 = vadd.f32 %v2742_v41, %v2646_v30  ;;  %v2647_v39 = vadd.f32 %v3673_v46, %v5458_v19 }
 0x215   :  { %v2772_v1 = vadd.f32 %v2740_v63, %v2644_v52  ;;  %v2645_v58 = vadd.f32 %v3674_v37, %v5458_v19 }
 0x216   :  { %v2775_v50 = vadd.f32 %v2743_v26, %v2647_v39  ;;  %v2806_v12 = vmax.f32 %v2774_v8, 0.0 }
 0x217   :  { %v2773_v60 = vadd.f32 %v2741_v38, %v2645_v58  ;;  %v2804_v28 = vmax.f32 %v2772_v1, 0.0 }
 0x218   :  { %v2807_v23 = vmax.f32 %v2775_v50, 0.0 }
 0x219   :  { %v2805_v48 = vmax.f32 %v2773_v60, 0.0 }
 0x21a   :  { %v3401_v11 = vpack.c.bf16 %v2807_v23, %v2806_v12 }
 0x21b   :  { %v3396_v17 = vpack.c.bf16 %v2805_v48, %v2804_v28 }
 0x21c   :  { %3432 = vst [vmem:[#allocation2 + $0x78] sm:$0xff] %v3401_v11  }
 0x21d   :  { %3431 = vst [vmem:[#allocation2 + $0x70] sm:$0xff] %v3396_v17  }
 0x21e   :  { %3890 = shalt.err (!%p3887_p4)
}
 0x21f   :  { %s3891_s8 = scalar_lea.hbm %s5594_s6, 2048 }
 0x220   :  { %p3892_p5 = scmp.ne.s32.totalorder %s5594_s6, %s3891_s8  ;;  %p3895_p6 = scmp.lt.u32.totalorder %s3891_s8, %s5594_s6 }
 0x222   :  { %p3897_p7 = pnand %p3895_p6, %p3892_p5 }
 0x224   :  { %3900 = shalt.err (!%p3897_p7)
}
 0x225   :  { %s3906_s1 = smov 4  }
 0x226   :  { %2979 = dma.vmem_to_hbm [thread:$0]  %s2974_s4, 2048, %s5594_s6, [#allocation3], %s3903_s17, %s3903_s17, %s3906_s1  }
 0x227   :  { %3901 = dma.done.wait [#allocation3], 2048  }
 0x228   :  { %3902 = vsyncadd [#allocation3], 4294965248 }
 0x229   :  { %2983 = vsyncpa [#allocation3], 1 }

</bundles_post_ra>
